<compile_context>
chip_gen: v6e
topology: v6e:2x2x1
jax: 0.10.0
libtpu: 0.0.40
codegen_flags: <defaults>
</compile_context>

<pallas_src>
import functools
import math

import jax
import jax.numpy as jnp
from jax.experimental import pallas as pl
from jax.experimental.pallas import tpu as pltpu


def _layernorm(y, gamma, beta, eps=1e-5):
    mu = jnp.mean(y, axis=-1, keepdims=True)
    var = jnp.mean((y - mu) ** 2, axis=-1, keepdims=True)
    return (y - mu) * jax.lax.rsqrt(var + eps) * gamma + beta


def decoder_layer_kernel(
    xq_ref, xkv_ref,                     # activations (query tile / full seq)
    wqkv_ref, bqkv_ref, wo_ref,          # attention params
    w1_ref, b1_ref, w2_ref,              # FFN params
    vec_ref,                             # packed (6, D): bo, b2, g1, t1, g2, t2
    o_ref,                               # output tile
    k_scr, v_scr,                        # VMEM scratch: K/V for full sequence
    *, n_heads, head_dim, q_tile, seq_len,
):
    qi = pl.program_id(1)
    d_model = n_heads * head_dim
    scale = 1.0 / math.sqrt(head_dim)

    # ---- K/V projections for the full sequence: once per batch element. ----
    # The q-tile axis is "arbitrary", so this scratch persists across it.
    @pl.when(qi == 0)
    def _():
        xkv = xkv_ref[0].astype(jnp.bfloat16)                         # (S, D)
        k = jnp.dot(xkv, wqkv_ref[:, d_model:2 * d_model],
                    preferred_element_type=jnp.float32)
        k = k + bqkv_ref[:, d_model:2 * d_model]
        v = jnp.dot(xkv, wqkv_ref[:, 2 * d_model:3 * d_model],
                    preferred_element_type=jnp.float32)
        v = v + bqkv_ref[:, 2 * d_model:3 * d_model]
        k_scr[...] = k.astype(jnp.bfloat16)
        v_scr[...] = v.astype(jnp.bfloat16)

    xq_f32 = xq_ref[0]                                                # (tq, D)
    xq_bf16 = xq_f32.astype(jnp.bfloat16)

    # ---- Q projection for this query tile (Q slice of fused QKV weight). ----
    q = jnp.dot(xq_bf16, wqkv_ref[:, 0:d_model],
                preferred_element_type=jnp.float32) + bqkv_ref[:, 0:d_model]

    # ---- Causal mask, generated in-kernel (no (S, S) HBM input). ----
    q_pos = qi * q_tile + jax.lax.broadcasted_iota(
        jnp.int32, (q_tile, seq_len), 0)
    k_pos = jax.lax.broadcasted_iota(jnp.int32, (q_tile, seq_len), 1)
    causal = k_pos <= q_pos                                           # (tq, S)

    k_all = k_scr[...]                                                # (S, D) bf16
    v_all = v_scr[...]                                                # (S, D) bf16
    wo = wo_ref[...]                                                  # (D, D) bf16

    # ---- Per-head attention; accumulate each head directly into W_o. ----
    attn = jnp.zeros((q_tile, d_model), jnp.float32)
    for h in range(n_heads):
        lo, hi = h * head_dim, (h + 1) * head_dim
        qh = (q[:, lo:hi] * scale).astype(jnp.bfloat16)               # (tq, Dh)
        kh = k_all[:, lo:hi]                                          # (S, Dh)
        vh = v_all[:, lo:hi]                                          # (S, Dh)
        s = jax.lax.dot_general(                                      # q @ k^T
            qh, kh, (((1,), (1,)), ((), ())),
            preferred_element_type=jnp.float32)                       # (tq, S)
        s = jnp.where(causal, s, -1e30)
        m = jnp.max(s, axis=-1, keepdims=True)
        p = jnp.exp(s - m)
        p = p * pl.reciprocal(jnp.sum(p, axis=-1, keepdims=True), approx=True)
        oh = jnp.dot(p.astype(jnp.bfloat16), vh,
                     preferred_element_type=jnp.float32)              # (tq, Dh)
        attn = attn + jnp.dot(oh.astype(jnp.bfloat16), wo[lo:hi, :],
                              preferred_element_type=jnp.float32)     # (tq, D)
    attn = attn + vec_ref[0:1, :]                                     # + b_o

    # ---- Residual + LayerNorm 1 (f32). ----
    x1 = _layernorm(xq_f32 + attn, vec_ref[2:3, :], vec_ref[3:4, :])

    # ---- FFN: linear1 -> ReLU -> linear2 (bf16 operands, f32 accumulate). ----
    h1 = jnp.dot(x1.astype(jnp.bfloat16), w1_ref[...],
                 preferred_element_type=jnp.float32) + b1_ref[...]
    h1 = jnp.maximum(h1, 0.0)
    ff = jnp.dot(h1.astype(jnp.bfloat16), w2_ref[...],
                 preferred_element_type=jnp.float32) + vec_ref[1:2, :]

    # ---- Residual + LayerNorm 2 (f32). ----
    o_ref[0] = _layernorm(x1 + ff, vec_ref[4:5, :], vec_ref[5:6, :])


def pack_params(params):
    """Repack torch-layout f32 params into kernel-ready (bf16 weight) arrays."""
    (wq, wk, wv, bq, bk, bv, wo, bo, w1, b1, w2, b2, g1, t1, g2, t2) = params
    wqkv = jnp.concatenate([wq, wk, wv], axis=1).astype(jnp.bfloat16)  # (D, 3D)
    bqkv = jnp.concatenate([bq, bk, bv], axis=1)                       # (1, 3D)
    vecs = jnp.concatenate([bo, b2, g1, t1, g2, t2], axis=0)           # (6, D)
    return (wqkv, bqkv, wo.astype(jnp.bfloat16),
            w1.astype(jnp.bfloat16), b1, w2.astype(jnp.bfloat16), vecs)


def decoder_layer(x, packed, *, n_heads, q_tile=128, use_buffered_weights=True):
    B, S, D = x.shape
    head_dim = D // n_heads
    tq = min(q_tile, S)
    assert S % tq == 0 and (tq == S or tq % 8 == 0), "query tile must tile S"
    nq = S // tq

    wqkv, bqkv, wo, w1, b1, w2, vecs = packed

    def _weight_spec(shape):
        nd = len(shape)
        idx = lambda b, q, _nd=nd: (0,) * _nd
        if use_buffered_weights:
            # Constant block index -> single buffering is sufficient; halves
            # the resident VMEM footprint of the weight set.
            return pl.BlockSpec(shape, idx, pipeline_mode=pl.Buffered(1))
        return pl.BlockSpec(shape, idx)

    in_specs = [
        pl.BlockSpec((1, tq, D), lambda b, q: (b, q, 0)),   # x, query tile
        pl.BlockSpec((1, S, D), lambda b, q: (b, 0, 0)),    # x, full seq (K/V)
        _weight_spec(wqkv.shape),
        _weight_spec(bqkv.shape),
        _weight_spec(wo.shape),
        _weight_spec(w1.shape),
        _weight_spec(b1.shape),
        _weight_spec(w2.shape),
        _weight_spec(vecs.shape),
    ]

    kernel = functools.partial(
        decoder_layer_kernel,
        n_heads=n_heads, head_dim=head_dim, q_tile=tq, seq_len=S,
    )

    return pl.pallas_call(
        kernel,
        out_shape=jax.ShapeDtypeStruct((B, S, D), jnp.float32),
        grid_spec=pltpu.PrefetchScalarGridSpec(
            num_scalar_prefetch=0,
            grid=(B, nq),
            in_specs=in_specs,
            out_specs=pl.BlockSpec((1, tq, D), lambda b, q: (b, q, 0)),
            scratch_shapes=[
                pltpu.VMEM((S, D), jnp.bfloat16),   # K, full sequence
                pltpu.VMEM((S, D), jnp.bfloat16),   # V, full sequence
            ],
        ),
        compiler_params=pltpu.CompilerParams(
            dimension_semantics=("parallel", "arbitrary"),
            vmem_limit_bytes=48 * 1024 * 1024,
        ),
    )(x, x, wqkv, bqkv, wo, w1, b1, w2, vecs)


def decoder_layer_ref(x, attn_mask, params, *, n_heads):
    """Pure-JAX f32 reference mirroring torch semantics (eval mode)."""
    (wq, wk, wv, bq, bk, bv, wo, bo, w1, b1, w2, b2, g1, t1, g2, t2) = params
    B, S, D = x.shape
    Dh = D // n_heads
    scale = 1.0 / math.sqrt(Dh)

    q = x @ wq + bq
    k = x @ wk + bk
    v = x @ wv + bv
    q = q.reshape(B, S, n_heads, Dh).transpose(0, 2, 1, 3) * scale
    k = k.reshape(B, S, n_heads, Dh).transpose(0, 2, 1, 3)
    v = v.reshape(B, S, n_heads, Dh).transpose(0, 2, 1, 3)
    s = jnp.einsum("bhqd,bhkd->bhqk", q, k) + attn_mask
    p = jax.nn.softmax(s, axis=-1)
    o = jnp.einsum("bhqk,bhkd->bhqd", p, v).transpose(0, 2, 1, 3).reshape(B, S, D)
    attn = o @ wo + bo

    x1 = _layernorm(x + attn, g1, t1)
    ff = jnp.maximum(x1 @ w1 + b1, 0.0) @ w2 + b2
    return _layernorm(x1 + ff, g2, t2)


def make_params(key, d_model, n_heads, dim_ff):
    ks = jax.random.split(key, 12)
    std = 0.02
    wq = jax.random.normal(ks[0], (d_model, d_model), jnp.float32) * std
    wk = jax.random.normal(ks[1], (d_model, d_model), jnp.float32) * std
    wv = jax.random.normal(ks[2], (d_model, d_model), jnp.float32) * std
    bq = jax.random.normal(ks[3], (1, d_model), jnp.float32) * std
    bk = jax.random.normal(ks[4], (1, d_model), jnp.float32) * std
    bv = jax.random.normal(ks[5], (1, d_model), jnp.float32) * std
    wo = jax.random.normal(ks[6], (d_model, d_model), jnp.float32) * std
    bo = jax.random.normal(ks[7], (1, d_model), jnp.float32) * std
    w1 = jax.random.normal(ks[8], (d_model, dim_ff), jnp.float32) * std
    b1 = jax.random.normal(ks[9], (1, dim_ff), jnp.float32) * std
    w2 = jax.random.normal(ks[10], (dim_ff, d_model), jnp.float32) * std
    b2 = jax.random.normal(ks[11], (1, d_model), jnp.float32) * std
    g1 = jnp.ones((1, d_model), jnp.float32)
    t1 = jnp.zeros((1, d_model), jnp.float32)
    g2 = jnp.ones((1, d_model), jnp.float32)
    t2 = jnp.zeros((1, d_model), jnp.float32)
    return (wq, wk, wv, bq, bk, bv, wo, bo, w1, b1, w2, b2, g1, t1, g2, t2)


if __name__ == "__main__":
    B, S, D, H, FF = 2, 8, 32, 4, 64

    key = jax.random.PRNGKey(0)
    kx, kp = jax.random.split(key)
    x = jax.random.normal(kx, (B, S, D), jnp.float32)
    params = make_params(kp, D, H, FF)
    packed = pack_params(params)

    try:
        out = jax.block_until_ready(decoder_layer(x, packed, n_heads=H))
    except Exception:
        # pl.Buffered(1) (single-buffered constant-index weights) may be
        # rejected on some JAX versions; fall back to default double buffering.
        out = jax.block_until_ready(
            decoder_layer(x, packed, n_heads=H, use_buffered_weights=False))

    # f32 reference with an explicit causal additive mask (kernel builds the
    # same causal mask in-kernel from iota).
    causal = jnp.where(
        jnp.arange(S)[:, None] >= jnp.arange(S)[None, :], 0.0, -1e9
    ).astype(jnp.float32)
    ref = decoder_layer_ref(x, causal, params, n_heads=H)

    # bf16 matmul operands -> loosen tolerance vs. the all-f32 reference.
    assert jnp.allclose(out, ref, atol=2e-2, rtol=2e-2), "mismatch vs reference"

    print("KERNEL_OK")
</pallas_src>

<mosaic_0001>
module attributes {stable_mosaic.version = 11 : i64} {
  func.func @decoder_layer_kernel(%arg0: i32, %arg1: i32, %arg2: memref<1x8x32xf32, #tpu.memory_space<vmem>>, %arg3: memref<1x8x32xf32, #tpu.memory_space<vmem>>, %arg4: memref<32x96xbf16, #tpu.memory_space<vmem>>, %arg5: memref<1x96xf32, #tpu.memory_space<vmem>>, %arg6: memref<32x32xbf16, #tpu.memory_space<vmem>>, %arg7: memref<32x64xbf16, #tpu.memory_space<vmem>>, %arg8: memref<1x64xf32, #tpu.memory_space<vmem>>, %arg9: memref<64x32xbf16, #tpu.memory_space<vmem>>, %arg10: memref<6x32xf32, #tpu.memory_space<vmem>>, %arg11: memref<1x8x32xf32, #tpu.memory_space<vmem>>, %arg12: memref<8x32xbf16, #tpu.memory_space<vmem>>, %arg13: memref<8x32xbf16, #tpu.memory_space<vmem>>) attributes {dimension_semantics = [#tpu.dimension_semantics<parallel>, #tpu.dimension_semantics<arbitrary>], iteration_bounds = array<i64: 2, 1>, scalar_prefetch = 0 : i64, scratch_operands = 2 : i64, tpu.core_type = #tpu.core_type<tc>, window_params = [{transform_indices = @transform_0, window_bounds = array<i64: 1, 8, 32>}, {transform_indices = @transform_1, window_bounds = array<i64: 1, 8, 32>}, {pipeline_mode = #tpu.pipeline_mode<synchronous>, transform_indices = @transform_2, window_bounds = array<i64: 32, 96>}, {pipeline_mode = #tpu.pipeline_mode<synchronous>, transform_indices = @transform_3, window_bounds = array<i64: 1, 96>}, {pipeline_mode = #tpu.pipeline_mode<synchronous>, transform_indices = @transform_4, window_bounds = array<i64: 32, 32>}, {pipeline_mode = #tpu.pipeline_mode<synchronous>, transform_indices = @transform_5, window_bounds = array<i64: 32, 64>}, {pipeline_mode = #tpu.pipeline_mode<synchronous>, transform_indices = @transform_6, window_bounds = array<i64: 1, 64>}, {pipeline_mode = #tpu.pipeline_mode<synchronous>, transform_indices = @transform_7, window_bounds = array<i64: 64, 32>}, {pipeline_mode = #tpu.pipeline_mode<synchronous>, transform_indices = @transform_8, window_bounds = array<i64: 6, 32>}, {transform_indices = @transform_9, window_bounds = array<i64: 1, 8, 32>}]} {
    %c0_i32 = arith.constant 0 : i32
    %0 = arith.cmpi eq, %arg1, %c0_i32 : i32
    %1 = arith.extui %0 : i1 to i32
    %c0_i32_0 = arith.constant 0 : i32
    %2 = arith.cmpi ne, %1, %c0_i32_0 : i32
    scf.if %2 {
      %c0_71 = arith.constant 0 : index
      %c0_72 = arith.constant 0 : index
      %c0_73 = arith.constant 0 : index
      %191 = vector.load %arg3[%c0_71, %c0_72, %c0_73] : memref<1x8x32xf32, #tpu.memory_space<vmem>>, vector<1x8x32xf32>
      %192 = vector.shape_cast %191 : vector<1x8x32xf32> to vector<8x32xf32>
      %193 = arith.truncf %192 : vector<8x32xf32> to vector<8x32xbf16>
      %c0_74 = arith.constant 0 : index
      %c32 = arith.constant 32 : index
      %194 = vector.load %arg4[%c0_74, %c32] : memref<32x96xbf16, #tpu.memory_space<vmem>>, vector<32x32xbf16>
      %cst_75 = arith.constant dense<0.000000e+00> : vector<8x32xf32>
      %195 = tpu.matmul %193, %194, %cst_75 {dimension_numbers = #tpu.dot_dimension_numbers<[1], [0], [0], [1], [0, 0, 1, 1], [], []>} : vector<8x32xbf16>, vector<32x32xbf16>, vector<8x32xf32> -> vector<8x32xf32>
      %c0_76 = arith.constant 0 : index
      %c32_77 = arith.constant 32 : index
      %196 = vector.load %arg5[%c0_76, %c32_77] : memref<1x96xf32, #tpu.memory_space<vmem>>, vector<1x32xf32>
      %197 = vector.broadcast %196 : vector<1x32xf32> to vector<8x32xf32>
      %198 = arith.addf %195, %197 : vector<8x32xf32>
      %c0_78 = arith.constant 0 : index
      %c64 = arith.constant 64 : index
      %199 = vector.load %arg4[%c0_78, %c64] : memref<32x96xbf16, #tpu.memory_space<vmem>>, vector<32x32xbf16>
      %cst_79 = arith.constant dense<0.000000e+00> : vector<8x32xf32>
      %200 = tpu.matmul %193, %199, %cst_79 {dimension_numbers = #tpu.dot_dimension_numbers<[1], [0], [0], [1], [0, 0, 1, 1], [], []>} : vector<8x32xbf16>, vector<32x32xbf16>, vector<8x32xf32> -> vector<8x32xf32>
      %c0_80 = arith.constant 0 : index
      %c64_81 = arith.constant 64 : index
      %201 = vector.load %arg5[%c0_80, %c64_81] : memref<1x96xf32, #tpu.memory_space<vmem>>, vector<1x32xf32>
      %202 = vector.broadcast %201 : vector<1x32xf32> to vector<8x32xf32>
      %203 = arith.addf %200, %202 : vector<8x32xf32>
      %204 = arith.truncf %198 : vector<8x32xf32> to vector<8x32xbf16>
      %c0_82 = arith.constant 0 : index
      %c0_83 = arith.constant 0 : index
      %205 = vector.load %arg12[%c0_82, %c0_83] : memref<8x32xbf16, #tpu.memory_space<vmem>>, vector<8x32xbf16>
      tpu.vector_store %arg12[%c0_82, %c0_83], %204 {strides = array<i32>} : memref<8x32xbf16, #tpu.memory_space<vmem>>, vector<8x32xbf16>,
      %206 = arith.truncf %203 : vector<8x32xf32> to vector<8x32xbf16>
      %c0_84 = arith.constant 0 : index
      %c0_85 = arith.constant 0 : index
      %207 = vector.load %arg13[%c0_84, %c0_85] : memref<8x32xbf16, #tpu.memory_space<vmem>>, vector<8x32xbf16>
      tpu.vector_store %arg13[%c0_84, %c0_85], %206 {strides = array<i32>} : memref<8x32xbf16, #tpu.memory_space<vmem>>, vector<8x32xbf16>,
    } else {
    }
    %c0 = arith.constant 0 : index
    %c0_1 = arith.constant 0 : index
    %c0_2 = arith.constant 0 : index
    %3 = vector.load %arg2[%c0, %c0_1, %c0_2] : memref<1x8x32xf32, #tpu.memory_space<vmem>>, vector<1x8x32xf32>
    %4 = vector.shape_cast %3 : vector<1x8x32xf32> to vector<8x32xf32>
    %5 = arith.truncf %4 : vector<8x32xf32> to vector<8x32xbf16>
    %c0_3 = arith.constant 0 : index
    %c0_4 = arith.constant 0 : index
    %6 = vector.load %arg4[%c0_3, %c0_4] : memref<32x96xbf16, #tpu.memory_space<vmem>>, vector<32x32xbf16>
    %cst = arith.constant dense<0.000000e+00> : vector<8x32xf32>
    %7 = tpu.matmul %5, %6, %cst {dimension_numbers = #tpu.dot_dimension_numbers<[1], [0], [0], [1], [0, 0, 1, 1], [], []>} : vector<8x32xbf16>, vector<32x32xbf16>, vector<8x32xf32> -> vector<8x32xf32>
    %c0_5 = arith.constant 0 : index
    %c0_6 = arith.constant 0 : index
    %8 = vector.load %arg5[%c0_5, %c0_6] : memref<1x96xf32, #tpu.memory_space<vmem>>, vector<1x32xf32>
    %9 = vector.broadcast %8 : vector<1x32xf32> to vector<8x32xf32>
    %10 = arith.addf %7, %9 : vector<8x32xf32>
    %c8_i32 = arith.constant 8 : i32
    %11 = arith.muli %arg1, %c8_i32 : i32
    %12 = tpu.iota {dimensions = array<i32: 0>} : vector<8x8xi32>
    %13 = vector.broadcast %11 : i32 to vector<8x8xi32>
    %14 = arith.addi %13, %12 : vector<8x8xi32>
    %15 = tpu.iota {dimensions = array<i32: 1>} : vector<8x8xi32>
    %16 = arith.cmpi sle, %15, %14 : vector<8x8xi32>
    %c0_7 = arith.constant 0 : index
    %c0_8 = arith.constant 0 : index
    %17 = vector.load %arg12[%c0_7, %c0_8] : memref<8x32xbf16, #tpu.memory_space<vmem>>, vector<8x32xbf16>
    %c0_9 = arith.constant 0 : index
    %c0_10 = arith.constant 0 : index
    %18 = vector.load %arg13[%c0_9, %c0_10] : memref<8x32xbf16, #tpu.memory_space<vmem>>, vector<8x32xbf16>
    %c0_11 = arith.constant 0 : index
    %c0_12 = arith.constant 0 : index
    %19 = vector.load %arg6[%c0_11, %c0_12] : memref<32x32xbf16, #tpu.memory_space<vmem>>, vector<32x32xbf16>
    %cst_13 = arith.constant 0.000000e+00 : f32
    %20 = vector.broadcast %cst_13 : f32 to vector<8x32xf32>
    %21 = vector.extract_strided_slice %10 {offsets = [0, 0], sizes = [8, 8], strides = [1, 1]} : vector<8x32xf32> to vector<8x8xf32>
    %cst_14 = arith.constant 0.353553385 : f32
    %22 = vector.broadcast %cst_14 : f32 to vector<8x8xf32>
    %23 = arith.mulf %21, %22 : vector<8x8xf32>
    %24 = arith.truncf %23 : vector<8x8xf32> to vector<8x8xbf16>
    %25 = vector.extract_strided_slice %17 {offsets = [0, 0], sizes = [8, 8], strides = [1, 1]} : vector<8x32xbf16> to vector<8x8xbf16>
    %26 = vector.extract_strided_slice %18 {offsets = [0, 0], sizes = [8, 8], strides = [1, 1]} : vector<8x32xbf16> to vector<8x8xbf16>
    %cst_15 = arith.constant dense<0.000000e+00> : vector<8x8xf32>
    %27 = tpu.matmul %24, %25, %cst_15 {dimension_numbers = #tpu.dot_dimension_numbers<[1], [1], [0], [0], [0, 0, 1, 0], [], []>} : vector<8x8xbf16>, vector<8x8xbf16>, vector<8x8xf32> -> vector<8x8xf32>
    %cst_16 = arith.constant -1.000000e+30 : f32
    %28 = vector.broadcast %cst_16 : f32 to vector<8x8xf32>
    %29 = arith.select %16, %27, %28 : vector<8x8xi1>, vector<8x8xf32>
    %cst_17 = arith.constant dense<0xFF800000> : vector<8xf32>
    %30 = vector.multi_reduction <maximumf>, %29, %cst_17 [1] : vector<8x8xf32> to vector<8xf32>
    %31 = vector.shape_cast %30 : vector<8xf32> to vector<8x1xf32>
    %32 = vector.broadcast %31 : vector<8x1xf32> to vector<8x8xf32>
    %33 = arith.subf %29, %32 : vector<8x8xf32>
    %34 = math.exp %33 : vector<8x8xf32>
    %cst_18 = arith.constant dense<0.000000e+00> : vector<8xf32>
    %35 = vector.multi_reduction <add>, %34, %cst_18 [1] : vector<8x8xf32> to vector<8xf32>
    %36 = vector.shape_cast %35 : vector<8xf32> to vector<8x1xf32>
    %37 = tpu.reciprocal %36 {approx = true} : vector<8x1xf32> -> vector<8x1xf32>
    %38 = vector.broadcast %37 : vector<8x1xf32> to vector<8x8xf32>
    %39 = arith.mulf %34, %38 : vector<8x8xf32>
    %40 = arith.truncf %39 : vector<8x8xf32> to vector<8x8xbf16>
    %cst_19 = arith.constant dense<0.000000e+00> : vector<8x8xf32>
    %41 = tpu.matmul %40, %26, %cst_19 {dimension_numbers = #tpu.dot_dimension_numbers<[1], [0], [0], [1], [0, 0, 1, 1], [], []>} : vector<8x8xbf16>, vector<8x8xbf16>, vector<8x8xf32> -> vector<8x8xf32>
    %42 = arith.truncf %41 : vector<8x8xf32> to vector<8x8xbf16>
    %43 = vector.extract_strided_slice %19 {offsets = [0, 0], sizes = [8, 32], strides = [1, 1]} : vector<32x32xbf16> to vector<8x32xbf16>
    %cst_20 = arith.constant dense<0.000000e+00> : vector<8x32xf32>
    %44 = tpu.matmul %42, %43, %cst_20 {dimension_numbers = #tpu.dot_dimension_numbers<[1], [0], [0], [1], [0, 0, 1, 1], [], []>} : vector<8x8xbf16>, vector<8x32xbf16>, vector<8x32xf32> -> vector<8x32xf32>
    %45 = arith.addf %20, %44 : vector<8x32xf32>
    %46 = vector.extract_strided_slice %10 {offsets = [0, 8], sizes = [8, 8], strides = [1, 1]} : vector<8x32xf32> to vector<8x8xf32>
    %cst_21 = arith.constant 0.353553385 : f32
    %47 = vector.broadcast %cst_21 : f32 to vector<8x8xf32>
    %48 = arith.mulf %46, %47 : vector<8x8xf32>
    %49 = arith.truncf %48 : vector<8x8xf32> to vector<8x8xbf16>
    %50 = vector.extract_strided_slice %17 {offsets = [0, 8], sizes = [8, 8], strides = [1, 1]} : vector<8x32xbf16> to vector<8x8xbf16>
    %51 = vector.extract_strided_slice %18 {offsets = [0, 8], sizes = [8, 8], strides = [1, 1]} : vector<8x32xbf16> to vector<8x8xbf16>
    %cst_22 = arith.constant dense<0.000000e+00> : vector<8x8xf32>
    %52 = tpu.matmul %49, %50, %cst_22 {dimension_numbers = #tpu.dot_dimension_numbers<[1], [1], [0], [0], [0, 0, 1, 0], [], []>} : vector<8x8xbf16>, vector<8x8xbf16>, vector<8x8xf32> -> vector<8x8xf32>
    %cst_23 = arith.constant -1.000000e+30 : f32
    %53 = vector.broadcast %cst_23 : f32 to vector<8x8xf32>
    %54 = arith.select %16, %52, %53 : vector<8x8xi1>, vector<8x8xf32>
    %cst_24 = arith.constant dense<0xFF800000> : vector<8xf32>
    %55 = vector.multi_reduction <maximumf>, %54, %cst_24 [1] : vector<8x8xf32> to vector<8xf32>
    %56 = vector.shape_cast %55 : vector<8xf32> to vector<8x1xf32>
    %57 = vector.broadcast %56 : vector<8x1xf32> to vector<8x8xf32>
    %58 = arith.subf %54, %57 : vector<8x8xf32>
    %59 = math.exp %58 : vector<8x8xf32>
    %cst_25 = arith.constant dense<0.000000e+00> : vector<8xf32>
    %60 = vector.multi_reduction <add>, %59, %cst_25 [1] : vector<8x8xf32> to vector<8xf32>
    %61 = vector.shape_cast %60 : vector<8xf32> to vector<8x1xf32>
    %62 = tpu.reciprocal %61 {approx = true} : vector<8x1xf32> -> vector<8x1xf32>
    %63 = vector.broadcast %62 : vector<8x1xf32> to vector<8x8xf32>
    %64 = arith.mulf %59, %63 : vector<8x8xf32>
    %65 = arith.truncf %64 : vector<8x8xf32> to vector<8x8xbf16>
    %cst_26 = arith.constant dense<0.000000e+00> : vector<8x8xf32>
    %66 = tpu.matmul %65, %51, %cst_26 {dimension_numbers = #tpu.dot_dimension_numbers<[1], [0], [0], [1], [0, 0, 1, 1], [], []>} : vector<8x8xbf16>, vector<8x8xbf16>, vector<8x8xf32> -> vector<8x8xf32>
    %67 = arith.truncf %66 : vector<8x8xf32> to vector<8x8xbf16>
    %68 = vector.extract_strided_slice %19 {offsets = [8, 0], sizes = [8, 32], strides = [1, 1]} : vector<32x32xbf16> to vector<8x32xbf16>
    %cst_27 = arith.constant dense<0.000000e+00> : vector<8x32xf32>
    %69 = tpu.matmul %67, %68, %cst_27 {dimension_numbers = #tpu.dot_dimension_numbers<[1], [0], [0], [1], [0, 0, 1, 1], [], []>} : vector<8x8xbf16>, vector<8x32xbf16>, vector<8x32xf32> -> vector<8x32xf32>
    %70 = arith.addf %45, %69 : vector<8x32xf32>
    %71 = vector.extract_strided_slice %10 {offsets = [0, 16], sizes = [8, 8], strides = [1, 1]} : vector<8x32xf32> to vector<8x8xf32>
    %cst_28 = arith.constant 0.353553385 : f32
    %72 = vector.broadcast %cst_28 : f32 to vector<8x8xf32>
    %73 = arith.mulf %71, %72 : vector<8x8xf32>
    %74 = arith.truncf %73 : vector<8x8xf32> to vector<8x8xbf16>
    %75 = vector.extract_strided_slice %17 {offsets = [0, 16], sizes = [8, 8], strides = [1, 1]} : vector<8x32xbf16> to vector<8x8xbf16>
    %76 = vector.extract_strided_slice %18 {offsets = [0, 16], sizes = [8, 8], strides = [1, 1]} : vector<8x32xbf16> to vector<8x8xbf16>
    %cst_29 = arith.constant dense<0.000000e+00> : vector<8x8xf32>
    %77 = tpu.matmul %74, %75, %cst_29 {dimension_numbers = #tpu.dot_dimension_numbers<[1], [1], [0], [0], [0, 0, 1, 0], [], []>} : vector<8x8xbf16>, vector<8x8xbf16>, vector<8x8xf32> -> vector<8x8xf32>
    %cst_30 = arith.constant -1.000000e+30 : f32
    %78 = vector.broadcast %cst_30 : f32 to vector<8x8xf32>
    %79 = arith.select %16, %77, %78 : vector<8x8xi1>, vector<8x8xf32>
    %cst_31 = arith.constant dense<0xFF800000> : vector<8xf32>
    %80 = vector.multi_reduction <maximumf>, %79, %cst_31 [1] : vector<8x8xf32> to vector<8xf32>
    %81 = vector.shape_cast %80 : vector<8xf32> to vector<8x1xf32>
    %82 = vector.broadcast %81 : vector<8x1xf32> to vector<8x8xf32>
    %83 = arith.subf %79, %82 : vector<8x8xf32>
    %84 = math.exp %83 : vector<8x8xf32>
    %cst_32 = arith.constant dense<0.000000e+00> : vector<8xf32>
    %85 = vector.multi_reduction <add>, %84, %cst_32 [1] : vector<8x8xf32> to vector<8xf32>
    %86 = vector.shape_cast %85 : vector<8xf32> to vector<8x1xf32>
    %87 = tpu.reciprocal %86 {approx = true} : vector<8x1xf32> -> vector<8x1xf32>
    %88 = vector.broadcast %87 : vector<8x1xf32> to vector<8x8xf32>
    %89 = arith.mulf %84, %88 : vector<8x8xf32>
    %90 = arith.truncf %89 : vector<8x8xf32> to vector<8x8xbf16>
    %cst_33 = arith.constant dense<0.000000e+00> : vector<8x8xf32>
    %91 = tpu.matmul %90, %76, %cst_33 {dimension_numbers = #tpu.dot_dimension_numbers<[1], [0], [0], [1], [0, 0, 1, 1], [], []>} : vector<8x8xbf16>, vector<8x8xbf16>, vector<8x8xf32> -> vector<8x8xf32>
    %92 = arith.truncf %91 : vector<8x8xf32> to vector<8x8xbf16>
    %93 = vector.extract_strided_slice %19 {offsets = [16, 0], sizes = [8, 32], strides = [1, 1]} : vector<32x32xbf16> to vector<8x32xbf16>
    %cst_34 = arith.constant dense<0.000000e+00> : vector<8x32xf32>
    %94 = tpu.matmul %92, %93, %cst_34 {dimension_numbers = #tpu.dot_dimension_numbers<[1], [0], [0], [1], [0, 0, 1, 1], [], []>} : vector<8x8xbf16>, vector<8x32xbf16>, vector<8x32xf32> -> vector<8x32xf32>
    %95 = arith.addf %70, %94 : vector<8x32xf32>
    %96 = vector.extract_strided_slice %10 {offsets = [0, 24], sizes = [8, 8], strides = [1, 1]} : vector<8x32xf32> to vector<8x8xf32>
    %cst_35 = arith.constant 0.353553385 : f32
    %97 = vector.broadcast %cst_35 : f32 to vector<8x8xf32>
    %98 = arith.mulf %96, %97 : vector<8x8xf32>
    %99 = arith.truncf %98 : vector<8x8xf32> to vector<8x8xbf16>
    %100 = vector.extract_strided_slice %17 {offsets = [0, 24], sizes = [8, 8], strides = [1, 1]} : vector<8x32xbf16> to vector<8x8xbf16>
    %101 = vector.extract_strided_slice %18 {offsets = [0, 24], sizes = [8, 8], strides = [1, 1]} : vector<8x32xbf16> to vector<8x8xbf16>
    %cst_36 = arith.constant dense<0.000000e+00> : vector<8x8xf32>
    %102 = tpu.matmul %99, %100, %cst_36 {dimension_numbers = #tpu.dot_dimension_numbers<[1], [1], [0], [0], [0, 0, 1, 0], [], []>} : vector<8x8xbf16>, vector<8x8xbf16>, vector<8x8xf32> -> vector<8x8xf32>
    %cst_37 = arith.constant -1.000000e+30 : f32
    %103 = vector.broadcast %cst_37 : f32 to vector<8x8xf32>
    %104 = arith.select %16, %102, %103 : vector<8x8xi1>, vector<8x8xf32>
    %cst_38 = arith.constant dense<0xFF800000> : vector<8xf32>
    %105 = vector.multi_reduction <maximumf>, %104, %cst_38 [1] : vector<8x8xf32> to vector<8xf32>
    %106 = vector.shape_cast %105 : vector<8xf32> to vector<8x1xf32>
    %107 = vector.broadcast %106 : vector<8x1xf32> to vector<8x8xf32>
    %108 = arith.subf %104, %107 : vector<8x8xf32>
    %109 = math.exp %108 : vector<8x8xf32>
    %cst_39 = arith.constant dense<0.000000e+00> : vector<8xf32>
    %110 = vector.multi_reduction <add>, %109, %cst_39 [1] : vector<8x8xf32> to vector<8xf32>
    %111 = vector.shape_cast %110 : vector<8xf32> to vector<8x1xf32>
    %112 = tpu.reciprocal %111 {approx = true} : vector<8x1xf32> -> vector<8x1xf32>
    %113 = vector.broadcast %112 : vector<8x1xf32> to vector<8x8xf32>
    %114 = arith.mulf %109, %113 : vector<8x8xf32>
    %115 = arith.truncf %114 : vector<8x8xf32> to vector<8x8xbf16>
    %cst_40 = arith.constant dense<0.000000e+00> : vector<8x8xf32>
    %116 = tpu.matmul %115, %101, %cst_40 {dimension_numbers = #tpu.dot_dimension_numbers<[1], [0], [0], [1], [0, 0, 1, 1], [], []>} : vector<8x8xbf16>, vector<8x8xbf16>, vector<8x8xf32> -> vector<8x8xf32>
    %117 = arith.truncf %116 : vector<8x8xf32> to vector<8x8xbf16>
    %118 = vector.extract_strided_slice %19 {offsets = [24, 0], sizes = [8, 32], strides = [1, 1]} : vector<32x32xbf16> to vector<8x32xbf16>
    %cst_41 = arith.constant dense<0.000000e+00> : vector<8x32xf32>
    %119 = tpu.matmul %117, %118, %cst_41 {dimension_numbers = #tpu.dot_dimension_numbers<[1], [0], [0], [1], [0, 0, 1, 1], [], []>} : vector<8x8xbf16>, vector<8x32xbf16>, vector<8x32xf32> -> vector<8x32xf32>
    %120 = arith.addf %95, %119 : vector<8x32xf32>
    %c0_42 = arith.constant 0 : index
    %c0_43 = arith.constant 0 : index
    %121 = vector.load %arg10[%c0_42, %c0_43] : memref<6x32xf32, #tpu.memory_space<vmem>>, vector<1x32xf32>
    %122 = vector.broadcast %121 : vector<1x32xf32> to vector<8x32xf32>
    %123 = arith.addf %120, %122 : vector<8x32xf32>
    %124 = arith.addf %4, %123 : vector<8x32xf32>
    %c2 = arith.constant 2 : index
    %c0_44 = arith.constant 0 : index
    %125 = vector.load %arg10[%c2, %c0_44] : memref<6x32xf32, #tpu.memory_space<vmem>>, vector<1x32xf32>
    %c3 = arith.constant 3 : index
    %c0_45 = arith.constant 0 : index
    %126 = vector.load %arg10[%c3, %c0_45] : memref<6x32xf32, #tpu.memory_space<vmem>>, vector<1x32xf32>
    %cst_46 = arith.constant dense<0.000000e+00> : vector<8xf32>
    %127 = vector.multi_reduction <add>, %124, %cst_46 [1] : vector<8x32xf32> to vector<8xf32>
    %128 = vector.shape_cast %127 : vector<8xf32> to vector<8x1xf32>
    %cst_47 = arith.constant 3.200000e+01 : f32
    %129 = vector.broadcast %cst_47 : f32 to vector<8x1xf32>
    %130 = arith.divf %128, %129 : vector<8x1xf32>
    %131 = vector.broadcast %130 : vector<8x1xf32> to vector<8x32xf32>
    %132 = arith.subf %124, %131 : vector<8x32xf32>
    %133 = arith.mulf %132, %132 : vector<8x32xf32>
    %cst_48 = arith.constant dense<0.000000e+00> : vector<8xf32>
    %134 = vector.multi_reduction <add>, %133, %cst_48 [1] : vector<8x32xf32> to vector<8xf32>
    %135 = vector.shape_cast %134 : vector<8xf32> to vector<8x1xf32>
    %cst_49 = arith.constant 3.200000e+01 : f32
    %136 = vector.broadcast %cst_49 : f32 to vector<8x1xf32>
    %137 = arith.divf %135, %136 : vector<8x1xf32>
    %138 = vector.broadcast %130 : vector<8x1xf32> to vector<8x32xf32>
    %139 = arith.subf %124, %138 : vector<8x32xf32>
    %cst_50 = arith.constant 9.99999974E-6 : f32
    %140 = vector.broadcast %cst_50 : f32 to vector<8x1xf32>
    %141 = arith.addf %137, %140 : vector<8x1xf32>
    %142 = math.rsqrt %141 : vector<8x1xf32>
    %143 = vector.broadcast %142 : vector<8x1xf32> to vector<8x32xf32>
    %144 = arith.mulf %139, %143 : vector<8x32xf32>
    %145 = vector.broadcast %125 : vector<1x32xf32> to vector<8x32xf32>
    %146 = arith.mulf %144, %145 : vector<8x32xf32>
    %147 = vector.broadcast %126 : vector<1x32xf32> to vector<8x32xf32>
    %148 = arith.addf %146, %147 : vector<8x32xf32>
    %149 = arith.truncf %148 : vector<8x32xf32> to vector<8x32xbf16>
    %c0_51 = arith.constant 0 : index
    %c0_52 = arith.constant 0 : index
    %150 = vector.load %arg7[%c0_51, %c0_52] : memref<32x64xbf16, #tpu.memory_space<vmem>>, vector<32x64xbf16>
    %cst_53 = arith.constant dense<0.000000e+00> : vector<8x64xf32>
    %151 = tpu.matmul %149, %150, %cst_53 {dimension_numbers = #tpu.dot_dimension_numbers<[1], [0], [0], [1], [0, 0, 1, 1], [], []>} : vector<8x32xbf16>, vector<32x64xbf16>, vector<8x64xf32> -> vector<8x64xf32>
    %c0_54 = arith.constant 0 : index
    %c0_55 = arith.constant 0 : index
    %152 = vector.load %arg8[%c0_54, %c0_55] : memref<1x64xf32, #tpu.memory_space<vmem>>, vector<1x64xf32>
    %153 = vector.broadcast %152 : vector<1x64xf32> to vector<8x64xf32>
    %154 = arith.addf %151, %153 : vector<8x64xf32>
    %cst_56 = arith.constant 0.000000e+00 : f32
    %155 = vector.broadcast %cst_56 : f32 to vector<8x64xf32>
    %156 = arith.maximumf %154, %155 : vector<8x64xf32>
    %157 = arith.truncf %156 : vector<8x64xf32> to vector<8x64xbf16>
    %c0_57 = arith.constant 0 : index
    %c0_58 = arith.constant 0 : index
    %158 = vector.load %arg9[%c0_57, %c0_58] : memref<64x32xbf16, #tpu.memory_space<vmem>>, vector<64x32xbf16>
    %cst_59 = arith.constant dense<0.000000e+00> : vector<8x32xf32>
    %159 = tpu.matmul %157, %158, %cst_59 {dimension_numbers = #tpu.dot_dimension_numbers<[1], [0], [0], [1], [0, 0, 1, 1], [], []>} : vector<8x64xbf16>, vector<64x32xbf16>, vector<8x32xf32> -> vector<8x32xf32>
    %c1 = arith.constant 1 : index
    %c0_60 = arith.constant 0 : index
    %160 = vector.load %arg10[%c1, %c0_60] : memref<6x32xf32, #tpu.memory_space<vmem>>, vector<1x32xf32>
    %161 = vector.broadcast %160 : vector<1x32xf32> to vector<8x32xf32>
    %162 = arith.addf %159, %161 : vector<8x32xf32>
    %163 = arith.addf %148, %162 : vector<8x32xf32>
    %c4 = arith.constant 4 : index
    %c0_61 = arith.constant 0 : index
    %164 = vector.load %arg10[%c4, %c0_61] : memref<6x32xf32, #tpu.memory_space<vmem>>, vector<1x32xf32>
    %c5 = arith.constant 5 : index
    %c0_62 = arith.constant 0 : index
    %165 = vector.load %arg10[%c5, %c0_62] : memref<6x32xf32, #tpu.memory_space<vmem>>, vector<1x32xf32>
    %cst_63 = arith.constant dense<0.000000e+00> : vector<8xf32>
    %166 = vector.multi_reduction <add>, %163, %cst_63 [1] : vector<8x32xf32> to vector<8xf32>
    %167 = vector.shape_cast %166 : vector<8xf32> to vector<8x1xf32>
    %cst_64 = arith.constant 3.200000e+01 : f32
    %168 = vector.broadcast %cst_64 : f32 to vector<8x1xf32>
    %169 = arith.divf %167, %168 : vector<8x1xf32>
    %170 = vector.broadcast %169 : vector<8x1xf32> to vector<8x32xf32>
    %171 = arith.subf %163, %170 : vector<8x32xf32>
    %172 = arith.mulf %171, %171 : vector<8x32xf32>
    %cst_65 = arith.constant dense<0.000000e+00> : vector<8xf32>
    %173 = vector.multi_reduction <add>, %172, %cst_65 [1] : vector<8x32xf32> to vector<8xf32>
    %174 = vector.shape_cast %173 : vector<8xf32> to vector<8x1xf32>
    %cst_66 = arith.constant 3.200000e+01 : f32
    %175 = vector.broadcast %cst_66 : f32 to vector<8x1xf32>
    %176 = arith.divf %174, %175 : vector<8x1xf32>
    %177 = vector.broadcast %169 : vector<8x1xf32> to vector<8x32xf32>
    %178 = arith.subf %163, %177 : vector<8x32xf32>
    %cst_67 = arith.constant 9.99999974E-6 : f32
    %179 = vector.broadcast %cst_67 : f32 to vector<8x1xf32>
    %180 = arith.addf %176, %179 : vector<8x1xf32>
    %181 = math.rsqrt %180 : vector<8x1xf32>
    %182 = vector.broadcast %181 : vector<8x1xf32> to vector<8x32xf32>
    %183 = arith.mulf %178, %182 : vector<8x32xf32>
    %184 = vector.broadcast %164 : vector<1x32xf32> to vector<8x32xf32>
    %185 = arith.mulf %183, %184 : vector<8x32xf32>
    %186 = vector.broadcast %165 : vector<1x32xf32> to vector<8x32xf32>
    %187 = arith.addf %185, %186 : vector<8x32xf32>
    %c0_68 = arith.constant 0 : index
    %c0_69 = arith.constant 0 : index
    %c0_70 = arith.constant 0 : index
    %188 = vector.load %arg11[%c0_68, %c0_69, %c0_70] : memref<1x8x32xf32, #tpu.memory_space<vmem>>, vector<1x8x32xf32>
    %189 = vector.shape_cast %188 : vector<1x8x32xf32> to vector<8x32xf32>
    %190 = vector.shape_cast %187 : vector<8x32xf32> to vector<1x8x32xf32>
    tpu.vector_store %arg11[%c0_68, %c0_69, %c0_70], %190 {strides = array<i32>} : memref<1x8x32xf32, #tpu.memory_space<vmem>>, vector<1x8x32xf32>,
    return
  }
  func.func @transform_0(%arg0: i32, %arg1: i32) -> (i32, i32, i32) {
    %c0_i32 = arith.constant 0 : i32
    %c0_i32_0 = arith.constant 0 : i32
    return %arg0, %arg1, %c0_i32 : i32, i32, i32
  }
  func.func @transform_1(%arg0: i32, %arg1: i32) -> (i32, i32, i32) {
    %c0_i32 = arith.constant 0 : i32
    %c0_i32_0 = arith.constant 0 : i32
    %c0_i32_1 = arith.constant 0 : i32
    return %arg0, %c0_i32, %c0_i32_0 : i32, i32, i32
  }
  func.func @transform_2(%arg0: i32, %arg1: i32) -> (i32, i32) {
    %c0_i32 = arith.constant 0 : i32
    %c0_i32_0 = arith.constant 0 : i32
    %c0_i32_1 = arith.constant 0 : i32
    return %c0_i32, %c0_i32_0 : i32, i32
  }
  func.func @transform_3(%arg0: i32, %arg1: i32) -> (i32, i32) {
    %c0_i32 = arith.constant 0 : i32
    %c0_i32_0 = arith.constant 0 : i32
    %c0_i32_1 = arith.constant 0 : i32
    return %c0_i32, %c0_i32_0 : i32, i32
  }
  func.func @transform_4(%arg0: i32, %arg1: i32) -> (i32, i32) {
    %c0_i32 = arith.constant 0 : i32
    %c0_i32_0 = arith.constant 0 : i32
    %c0_i32_1 = arith.constant 0 : i32
    return %c0_i32, %c0_i32_0 : i32, i32
  }
  func.func @transform_5(%arg0: i32, %arg1: i32) -> (i32, i32) {
    %c0_i32 = arith.constant 0 : i32
    %c0_i32_0 = arith.constant 0 : i32
    %c0_i32_1 = arith.constant 0 : i32
    return %c0_i32, %c0_i32_0 : i32, i32
  }
  func.func @transform_6(%arg0: i32, %arg1: i32) -> (i32, i32) {
    %c0_i32 = arith.constant 0 : i32
    %c0_i32_0 = arith.constant 0 : i32
    %c0_i32_1 = arith.constant 0 : i32
    return %c0_i32, %c0_i32_0 : i32, i32
  }
  func.func @transform_7(%arg0: i32, %arg1: i32) -> (i32, i32) {
    %c0_i32 = arith.constant 0 : i32
    %c0_i32_0 = arith.constant 0 : i32
    %c0_i32_1 = arith.constant 0 : i32
    return %c0_i32, %c0_i32_0 : i32, i32
  }
  func.func @transform_8(%arg0: i32, %arg1: i32) -> (i32, i32) {
    %c0_i32 = arith.constant 0 : i32
    %c0_i32_0 = arith.constant 0 : i32
    %c0_i32_1 = arith.constant 0 : i32
    return %c0_i32, %c0_i32_0 : i32, i32
  }
  func.func @transform_9(%arg0: i32, %arg1: i32) -> (i32, i32, i32) {
    %c0_i32 = arith.constant 0 : i32
    %c0_i32_0 = arith.constant 0 : i32
    return %arg0, %arg1, %c0_i32 : i32, i32, i32
  }
}

module attributes {stable_mosaic.version = 11 : i64} {
  func.func @decoder_layer_kernel(%arg0: i32, %arg1: i32, %arg2: memref<1x8x32xf32, #tpu.memory_space<vmem>>, %arg3: memref<1x8x32xf32, #tpu.memory_space<vmem>>, %arg4: memref<32x96xbf16, #tpu.memory_space<vmem>>, %arg5: memref<1x96xf32, #tpu.memory_space<vmem>>, %arg6: memref<32x32xbf16, #tpu.memory_space<vmem>>, %arg7: memref<32x64xbf16, #tpu.memory_space<vmem>>, %arg8: memref<1x64xf32, #tpu.memory_space<vmem>>, %arg9: memref<64x32xbf16, #tpu.memory_space<vmem>>, %arg10: memref<6x32xf32, #tpu.memory_space<vmem>>, %arg11: memref<1x8x32xf32, #tpu.memory_space<vmem>>, %arg12: memref<8x32xbf16, #tpu.memory_space<vmem>>, %arg13: memref<8x32xbf16, #tpu.memory_space<vmem>>) attributes {dimension_semantics = [#tpu.dimension_semantics<parallel>, #tpu.dimension_semantics<arbitrary>], iteration_bounds = array<i64: 2, 1>, scalar_prefetch = 0 : i64, scratch_operands = 2 : i64, tpu.core_type = #tpu.core_type<tc>, window_params = [{transform_indices = @transform_0, window_bounds = array<i64: 1, 8, 32>}, {transform_indices = @transform_1, window_bounds = array<i64: 1, 8, 32>}, {pipeline_mode = #tpu.pipeline_mode<synchronous>, transform_indices = @transform_2, window_bounds = array<i64: 32, 96>}, {pipeline_mode = #tpu.pipeline_mode<synchronous>, transform_indices = @transform_3, window_bounds = array<i64: 1, 96>}, {pipeline_mode = #tpu.pipeline_mode<synchronous>, transform_indices = @transform_4, window_bounds = array<i64: 32, 32>}, {pipeline_mode = #tpu.pipeline_mode<synchronous>, transform_indices = @transform_5, window_bounds = array<i64: 32, 64>}, {pipeline_mode = #tpu.pipeline_mode<synchronous>, transform_indices = @transform_6, window_bounds = array<i64: 1, 64>}, {pipeline_mode = #tpu.pipeline_mode<synchronous>, transform_indices = @transform_7, window_bounds = array<i64: 64, 32>}, {pipeline_mode = #tpu.pipeline_mode<synchronous>, transform_indices = @transform_8, window_bounds = array<i64: 6, 32>}, {transform_indices = @transform_9, window_bounds = array<i64: 1, 8, 32>}]} {
    %c0_i32 = arith.constant 0 : i32
    %0 = arith.cmpi eq, %arg1, %c0_i32 : i32
    %1 = arith.extui %0 : i1 to i32
    %c0_i32_0 = arith.constant 0 : i32
    %2 = arith.cmpi ne, %1, %c0_i32_0 : i32
    scf.if %2 {
      %c0_71 = arith.constant 0 : index
      %c0_72 = arith.constant 0 : index
      %c0_73 = arith.constant 0 : index
      %191 = vector.load %arg3[%c0_71, %c0_72, %c0_73] : memref<1x8x32xf32, #tpu.memory_space<vmem>>, vector<1x8x32xf32>
      %192 = vector.shape_cast %191 : vector<1x8x32xf32> to vector<8x32xf32>
      %193 = arith.truncf %192 : vector<8x32xf32> to vector<8x32xbf16>
      %c0_74 = arith.constant 0 : index
      %c32 = arith.constant 32 : index
      %194 = vector.load %arg4[%c0_74, %c32] : memref<32x96xbf16, #tpu.memory_space<vmem>>, vector<32x32xbf16>
      %cst_75 = arith.constant dense<0.000000e+00> : vector<8x32xf32>
      %195 = tpu.matmul %193, %194, %cst_75 {dimension_numbers = #tpu.dot_dimension_numbers<[1], [0], [0], [1], [0, 0, 1, 1], [], []>} : vector<8x32xbf16>, vector<32x32xbf16>, vector<8x32xf32> -> vector<8x32xf32>
      %c0_76 = arith.constant 0 : index
      %c32_77 = arith.constant 32 : index
      %196 = vector.load %arg5[%c0_76, %c32_77] : memref<1x96xf32, #tpu.memory_space<vmem>>, vector<1x32xf32>
      %197 = vector.broadcast %196 : vector<1x32xf32> to vector<8x32xf32>
      %198 = arith.addf %195, %197 : vector<8x32xf32>
      %c0_78 = arith.constant 0 : index
      %c64 = arith.constant 64 : index
      %199 = vector.load %arg4[%c0_78, %c64] : memref<32x96xbf16, #tpu.memory_space<vmem>>, vector<32x32xbf16>
      %cst_79 = arith.constant dense<0.000000e+00> : vector<8x32xf32>
      %200 = tpu.matmul %193, %199, %cst_79 {dimension_numbers = #tpu.dot_dimension_numbers<[1], [0], [0], [1], [0, 0, 1, 1], [], []>} : vector<8x32xbf16>, vector<32x32xbf16>, vector<8x32xf32> -> vector<8x32xf32>
      %c0_80 = arith.constant 0 : index
      %c64_81 = arith.constant 64 : index
      %201 = vector.load %arg5[%c0_80, %c64_81] : memref<1x96xf32, #tpu.memory_space<vmem>>, vector<1x32xf32>
      %202 = vector.broadcast %201 : vector<1x32xf32> to vector<8x32xf32>
      %203 = arith.addf %200, %202 : vector<8x32xf32>
      %204 = arith.truncf %198 : vector<8x32xf32> to vector<8x32xbf16>
      %c0_82 = arith.constant 0 : index
      %c0_83 = arith.constant 0 : index
      %205 = vector.load %arg12[%c0_82, %c0_83] : memref<8x32xbf16, #tpu.memory_space<vmem>>, vector<8x32xbf16>
      tpu.vector_store %arg12[%c0_82, %c0_83], %204 {strides = array<i32>} : memref<8x32xbf16, #tpu.memory_space<vmem>>, vector<8x32xbf16>,
      %206 = arith.truncf %203 : vector<8x32xf32> to vector<8x32xbf16>
      %c0_84 = arith.constant 0 : index
      %c0_85 = arith.constant 0 : index
      %207 = vector.load %arg13[%c0_84, %c0_85] : memref<8x32xbf16, #tpu.memory_space<vmem>>, vector<8x32xbf16>
      tpu.vector_store %arg13[%c0_84, %c0_85], %206 {strides = array<i32>} : memref<8x32xbf16, #tpu.memory_space<vmem>>, vector<8x32xbf16>,
    } else {
    }
    %c0 = arith.constant 0 : index
    %c0_1 = arith.constant 0 : index
    %c0_2 = arith.constant 0 : index
    %3 = vector.load %arg2[%c0, %c0_1, %c0_2] : memref<1x8x32xf32, #tpu.memory_space<vmem>>, vector<1x8x32xf32>
    %4 = vector.shape_cast %3 : vector<1x8x32xf32> to vector<8x32xf32>
    %5 = arith.truncf %4 : vector<8x32xf32> to vector<8x32xbf16>
    %c0_3 = arith.constant 0 : index
    %c0_4 = arith.constant 0 : index
    %6 = vector.load %arg4[%c0_3, %c0_4] : memref<32x96xbf16, #tpu.memory_space<vmem>>, vector<32x32xbf16>
    %cst = arith.constant dense<0.000000e+00> : vector<8x32xf32>
    %7 = tpu.matmul %5, %6, %cst {dimension_numbers = #tpu.dot_dimension_numbers<[1], [0], [0], [1], [0, 0, 1, 1], [], []>} : vector<8x32xbf16>, vector<32x32xbf16>, vector<8x32xf32> -> vector<8x32xf32>
    %c0_5 = arith.constant 0 : index
    %c0_6 = arith.constant 0 : index
    %8 = vector.load %arg5[%c0_5, %c0_6] : memref<1x96xf32, #tpu.memory_space<vmem>>, vector<1x32xf32>
    %9 = vector.broadcast %8 : vector<1x32xf32> to vector<8x32xf32>
    %10 = arith.addf %7, %9 : vector<8x32xf32>
    %c8_i32 = arith.constant 8 : i32
    %11 = arith.muli %arg1, %c8_i32 : i32
    %12 = tpu.iota {dimensions = array<i32: 0>} : vector<8x8xi32>
    %13 = vector.broadcast %11 : i32 to vector<8x8xi32>
    %14 = arith.addi %13, %12 : vector<8x8xi32>
    %15 = tpu.iota {dimensions = array<i32: 1>} : vector<8x8xi32>
    %16 = arith.cmpi sle, %15, %14 : vector<8x8xi32>
    %c0_7 = arith.constant 0 : index
    %c0_8 = arith.constant 0 : index
    %17 = vector.load %arg12[%c0_7, %c0_8] : memref<8x32xbf16, #tpu.memory_space<vmem>>, vector<8x32xbf16>
    %c0_9 = arith.constant 0 : index
    %c0_10 = arith.constant 0 : index
    %18 = vector.load %arg13[%c0_9, %c0_10] : memref<8x32xbf16, #tpu.memory_space<vmem>>, vector<8x32xbf16>
    %c0_11 = arith.constant 0 : index
    %c0_12 = arith.constant 0 : index
    %19 = vector.load %arg6[%c0_11, %c0_12] : memref<32x32xbf16, #tpu.memory_space<vmem>>, vector<32x32xbf16>
    %cst_13 = arith.constant 0.000000e+00 : f32
    %20 = vector.broadcast %cst_13 : f32 to vector<8x32xf32>
    %21 = vector.extract_strided_slice %10 {offsets = [0, 0], sizes = [8, 8], strides = [1, 1]} : vector<8x32xf32> to vector<8x8xf32>
    %cst_14 = arith.constant 0.353553385 : f32
    %22 = vector.broadcast %cst_14 : f32 to vector<8x8xf32>
    %23 = arith.mulf %21, %22 : vector<8x8xf32>
    %24 = arith.truncf %23 : vector<8x8xf32> to vector<8x8xbf16>
    %25 = vector.extract_strided_slice %17 {offsets = [0, 0], sizes = [8, 8], strides = [1, 1]} : vector<8x32xbf16> to vector<8x8xbf16>
    %26 = vector.extract_strided_slice %18 {offsets = [0, 0], sizes = [8, 8], strides = [1, 1]} : vector<8x32xbf16> to vector<8x8xbf16>
    %cst_15 = arith.constant dense<0.000000e+00> : vector<8x8xf32>
    %27 = tpu.matmul %24, %25, %cst_15 {dimension_numbers = #tpu.dot_dimension_numbers<[1], [1], [0], [0], [0, 0, 1, 0], [], []>} : vector<8x8xbf16>, vector<8x8xbf16>, vector<8x8xf32> -> vector<8x8xf32>
    %cst_16 = arith.constant -1.000000e+30 : f32
    %28 = vector.broadcast %cst_16 : f32 to vector<8x8xf32>
    %29 = arith.select %16, %27, %28 : vector<8x8xi1>, vector<8x8xf32>
    %cst_17 = arith.constant dense<0xFF800000> : vector<8xf32>
    %30 = vector.multi_reduction <maximumf>, %29, %cst_17 [1] : vector<8x8xf32> to vector<8xf32>
    %31 = vector.shape_cast %30 : vector<8xf32> to vector<8x1xf32>
    %32 = vector.broadcast %31 : vector<8x1xf32> to vector<8x8xf32>
    %33 = arith.subf %29, %32 : vector<8x8xf32>
    %34 = math.exp %33 : vector<8x8xf32>
    %cst_18 = arith.constant dense<0.000000e+00> : vector<8xf32>
    %35 = vector.multi_reduction <add>, %34, %cst_18 [1] : vector<8x8xf32> to vector<8xf32>
    %36 = vector.shape_cast %35 : vector<8xf32> to vector<8x1xf32>
    %37 = tpu.reciprocal %36 {approx = true} : vector<8x1xf32> -> vector<8x1xf32>
    %38 = vector.broadcast %37 : vector<8x1xf32> to vector<8x8xf32>
    %39 = arith.mulf %34, %38 : vector<8x8xf32>
    %40 = arith.truncf %39 : vector<8x8xf32> to vector<8x8xbf16>
    %cst_19 = arith.constant dense<0.000000e+00> : vector<8x8xf32>
    %41 = tpu.matmul %40, %26, %cst_19 {dimension_numbers = #tpu.dot_dimension_numbers<[1], [0], [0], [1], [0, 0, 1, 1], [], []>} : vector<8x8xbf16>, vector<8x8xbf16>, vector<8x8xf32> -> vector<8x8xf32>
    %42 = arith.truncf %41 : vector<8x8xf32> to vector<8x8xbf16>
    %43 = vector.extract_strided_slice %19 {offsets = [0, 0], sizes = [8, 32], strides = [1, 1]} : vector<32x32xbf16> to vector<8x32xbf16>
    %cst_20 = arith.constant dense<0.000000e+00> : vector<8x32xf32>
    %44 = tpu.matmul %42, %43, %cst_20 {dimension_numbers = #tpu.dot_dimension_numbers<[1], [0], [0], [1], [0, 0, 1, 1], [], []>} : vector<8x8xbf16>, vector<8x32xbf16>, vector<8x32xf32> -> vector<8x32xf32>
    %45 = arith.addf %20, %44 : vector<8x32xf32>
    %46 = vector.extract_strided_slice %10 {offsets = [0, 8], sizes = [8, 8], strides = [1, 1]} : vector<8x32xf32> to vector<8x8xf32>
    %cst_21 = arith.constant 0.353553385 : f32
    %47 = vector.broadcast %cst_21 : f32 to vector<8x8xf32>
    %48 = arith.mulf %46, %47 : vector<8x8xf32>
    %49 = arith.truncf %48 : vector<8x8xf32> to vector<8x8xbf16>
    %50 = vector.extract_strided_slice %17 {offsets = [0, 8], sizes = [8, 8], strides = [1, 1]} : vector<8x32xbf16> to vector<8x8xbf16>
    %51 = vector.extract_strided_slice %18 {offsets = [0, 8], sizes = [8, 8], strides = [1, 1]} : vector<8x32xbf16> to vector<8x8xbf16>
    %cst_22 = arith.constant dense<0.000000e+00> : vector<8x8xf32>
    %52 = tpu.matmul %49, %50, %cst_22 {dimension_numbers = #tpu.dot_dimension_numbers<[1], [1], [0], [0], [0, 0, 1, 0], [], []>} : vector<8x8xbf16>, vector<8x8xbf16>, vector<8x8xf32> -> vector<8x8xf32>
    %cst_23 = arith.constant -1.000000e+30 : f32
    %53 = vector.broadcast %cst_23 : f32 to vector<8x8xf32>
    %54 = arith.select %16, %52, %53 : vector<8x8xi1>, vector<8x8xf32>
    %cst_24 = arith.constant dense<0xFF800000> : vector<8xf32>
    %55 = vector.multi_reduction <maximumf>, %54, %cst_24 [1] : vector<8x8xf32> to vector<8xf32>
    %56 = vector.shape_cast %55 : vector<8xf32> to vector<8x1xf32>
    %57 = vector.broadcast %56 : vector<8x1xf32> to vector<8x8xf32>
    %58 = arith.subf %54, %57 : vector<8x8xf32>
    %59 = math.exp %58 : vector<8x8xf32>
    %cst_25 = arith.constant dense<0.000000e+00> : vector<8xf32>
    %60 = vector.multi_reduction <add>, %59, %cst_25 [1] : vector<8x8xf32> to vector<8xf32>
    %61 = vector.shape_cast %60 : vector<8xf32> to vector<8x1xf32>
    %62 = tpu.reciprocal %61 {approx = true} : vector<8x1xf32> -> vector<8x1xf32>
    %63 = vector.broadcast %62 : vector<8x1xf32> to vector<8x8xf32>
    %64 = arith.mulf %59, %63 : vector<8x8xf32>
    %65 = arith.truncf %64 : vector<8x8xf32> to vector<8x8xbf16>
    %cst_26 = arith.constant dense<0.000000e+00> : vector<8x8xf32>
    %66 = tpu.matmul %65, %51, %cst_26 {dimension_numbers = #tpu.dot_dimension_numbers<[1], [0], [0], [1], [0, 0, 1, 1], [], []>} : vector<8x8xbf16>, vector<8x8xbf16>, vector<8x8xf32> -> vector<8x8xf32>
    %67 = arith.truncf %66 : vector<8x8xf32> to vector<8x8xbf16>
    %68 = vector.extract_strided_slice %19 {offsets = [8, 0], sizes = [8, 32], strides = [1, 1]} : vector<32x32xbf16> to vector<8x32xbf16>
    %cst_27 = arith.constant dense<0.000000e+00> : vector<8x32xf32>
    %69 = tpu.matmul %67, %68, %cst_27 {dimension_numbers = #tpu.dot_dimension_numbers<[1], [0], [0], [1], [0, 0, 1, 1], [], []>} : vector<8x8xbf16>, vector<8x32xbf16>, vector<8x32xf32> -> vector<8x32xf32>
    %70 = arith.addf %45, %69 : vector<8x32xf32>
    %71 = vector.extract_strided_slice %10 {offsets = [0, 16], sizes = [8, 8], strides = [1, 1]} : vector<8x32xf32> to vector<8x8xf32>
    %cst_28 = arith.constant 0.353553385 : f32
    %72 = vector.broadcast %cst_28 : f32 to vector<8x8xf32>
    %73 = arith.mulf %71, %72 : vector<8x8xf32>
    %74 = arith.truncf %73 : vector<8x8xf32> to vector<8x8xbf16>
    %75 = vector.extract_strided_slice %17 {offsets = [0, 16], sizes = [8, 8], strides = [1, 1]} : vector<8x32xbf16> to vector<8x8xbf16>
    %76 = vector.extract_strided_slice %18 {offsets = [0, 16], sizes = [8, 8], strides = [1, 1]} : vector<8x32xbf16> to vector<8x8xbf16>
    %cst_29 = arith.constant dense<0.000000e+00> : vector<8x8xf32>
    %77 = tpu.matmul %74, %75, %cst_29 {dimension_numbers = #tpu.dot_dimension_numbers<[1], [1], [0], [0], [0, 0, 1, 0], [], []>} : vector<8x8xbf16>, vector<8x8xbf16>, vector<8x8xf32> -> vector<8x8xf32>
    %cst_30 = arith.constant -1.000000e+30 : f32
    %78 = vector.broadcast %cst_30 : f32 to vector<8x8xf32>
    %79 = arith.select %16, %77, %78 : vector<8x8xi1>, vector<8x8xf32>
    %cst_31 = arith.constant dense<0xFF800000> : vector<8xf32>
    %80 = vector.multi_reduction <maximumf>, %79, %cst_31 [1] : vector<8x8xf32> to vector<8xf32>
    %81 = vector.shape_cast %80 : vector<8xf32> to vector<8x1xf32>
    %82 = vector.broadcast %81 : vector<8x1xf32> to vector<8x8xf32>
    %83 = arith.subf %79, %82 : vector<8x8xf32>
    %84 = math.exp %83 : vector<8x8xf32>
    %cst_32 = arith.constant dense<0.000000e+00> : vector<8xf32>
    %85 = vector.multi_reduction <add>, %84, %cst_32 [1] : vector<8x8xf32> to vector<8xf32>
    %86 = vector.shape_cast %85 : vector<8xf32> to vector<8x1xf32>
    %87 = tpu.reciprocal %86 {approx = true} : vector<8x1xf32> -> vector<8x1xf32>
    %88 = vector.broadcast %87 : vector<8x1xf32> to vector<8x8xf32>
    %89 = arith.mulf %84, %88 : vector<8x8xf32>
    %90 = arith.truncf %89 : vector<8x8xf32> to vector<8x8xbf16>
    %cst_33 = arith.constant dense<0.000000e+00> : vector<8x8xf32>
    %91 = tpu.matmul %90, %76, %cst_33 {dimension_numbers = #tpu.dot_dimension_numbers<[1], [0], [0], [1], [0, 0, 1, 1], [], []>} : vector<8x8xbf16>, vector<8x8xbf16>, vector<8x8xf32> -> vector<8x8xf32>
    %92 = arith.truncf %91 : vector<8x8xf32> to vector<8x8xbf16>
    %93 = vector.extract_strided_slice %19 {offsets = [16, 0], sizes = [8, 32], strides = [1, 1]} : vector<32x32xbf16> to vector<8x32xbf16>
    %cst_34 = arith.constant dense<0.000000e+00> : vector<8x32xf32>
    %94 = tpu.matmul %92, %93, %cst_34 {dimension_numbers = #tpu.dot_dimension_numbers<[1], [0], [0], [1], [0, 0, 1, 1], [], []>} : vector<8x8xbf16>, vector<8x32xbf16>, vector<8x32xf32> -> vector<8x32xf32>
    %95 = arith.addf %70, %94 : vector<8x32xf32>
    %96 = vector.extract_strided_slice %10 {offsets = [0, 24], sizes = [8, 8], strides = [1, 1]} : vector<8x32xf32> to vector<8x8xf32>
    %cst_35 = arith.constant 0.353553385 : f32
    %97 = vector.broadcast %cst_35 : f32 to vector<8x8xf32>
    %98 = arith.mulf %96, %97 : vector<8x8xf32>
    %99 = arith.truncf %98 : vector<8x8xf32> to vector<8x8xbf16>
    %100 = vector.extract_strided_slice %17 {offsets = [0, 24], sizes = [8, 8], strides = [1, 1]} : vector<8x32xbf16> to vector<8x8xbf16>
    %101 = vector.extract_strided_slice %18 {offsets = [0, 24], sizes = [8, 8], strides = [1, 1]} : vector<8x32xbf16> to vector<8x8xbf16>
    %cst_36 = arith.constant dense<0.000000e+00> : vector<8x8xf32>
    %102 = tpu.matmul %99, %100, %cst_36 {dimension_numbers = #tpu.dot_dimension_numbers<[1], [1], [0], [0], [0, 0, 1, 0], [], []>} : vector<8x8xbf16>, vector<8x8xbf16>, vector<8x8xf32> -> vector<8x8xf32>
    %cst_37 = arith.constant -1.000000e+30 : f32
    %103 = vector.broadcast %cst_37 : f32 to vector<8x8xf32>
    %104 = arith.select %16, %102, %103 : vector<8x8xi1>, vector<8x8xf32>
    %cst_38 = arith.constant dense<0xFF800000> : vector<8xf32>
    %105 = vector.multi_reduction <maximumf>, %104, %cst_38 [1] : vector<8x8xf32> to vector<8xf32>
    %106 = vector.shape_cast %105 : vector<8xf32> to vector<8x1xf32>
    %107 = vector.broadcast %106 : vector<8x1xf32> to vector<8x8xf32>
    %108 = arith.subf %104, %107 : vector<8x8xf32>
    %109 = math.exp %108 : vector<8x8xf32>
    %cst_39 = arith.constant dense<0.000000e+00> : vector<8xf32>
    %110 = vector.multi_reduction <add>, %109, %cst_39 [1] : vector<8x8xf32> to vector<8xf32>
    %111 = vector.shape_cast %110 : vector<8xf32> to vector<8x1xf32>
    %112 = tpu.reciprocal %111 {approx = true} : vector<8x1xf32> -> vector<8x1xf32>
    %113 = vector.broadcast %112 : vector<8x1xf32> to vector<8x8xf32>
    %114 = arith.mulf %109, %113 : vector<8x8xf32>
    %115 = arith.truncf %114 : vector<8x8xf32> to vector<8x8xbf16>
    %cst_40 = arith.constant dense<0.000000e+00> : vector<8x8xf32>
    %116 = tpu.matmul %115, %101, %cst_40 {dimension_numbers = #tpu.dot_dimension_numbers<[1], [0], [0], [1], [0, 0, 1, 1], [], []>} : vector<8x8xbf16>, vector<8x8xbf16>, vector<8x8xf32> -> vector<8x8xf32>
    %117 = arith.truncf %116 : vector<8x8xf32> to vector<8x8xbf16>
    %118 = vector.extract_strided_slice %19 {offsets = [24, 0], sizes = [8, 32], strides = [1, 1]} : vector<32x32xbf16> to vector<8x32xbf16>
    %cst_41 = arith.constant dense<0.000000e+00> : vector<8x32xf32>
    %119 = tpu.matmul %117, %118, %cst_41 {dimension_numbers = #tpu.dot_dimension_numbers<[1], [0], [0], [1], [0, 0, 1, 1], [], []>} : vector<8x8xbf16>, vector<8x32xbf16>, vector<8x32xf32> -> vector<8x32xf32>
    %120 = arith.addf %95, %119 : vector<8x32xf32>
    %c0_42 = arith.constant 0 : index
    %c0_43 = arith.constant 0 : index
    %121 = vector.load %arg10[%c0_42, %c0_43] : memref<6x32xf32, #tpu.memory_space<vmem>>, vector<1x32xf32>
    %122 = vector.broadcast %121 : vector<1x32xf32> to vector<8x32xf32>
    %123 = arith.addf %120, %122 : vector<8x32xf32>
    %124 = arith.addf %4, %123 : vector<8x32xf32>
    %c2 = arith.constant 2 : index
    %c0_44 = arith.constant 0 : index
    %125 = vector.load %arg10[%c2, %c0_44] : memref<6x32xf32, #tpu.memory_space<vmem>>, vector<1x32xf32>
    %c3 = arith.constant 3 : index
    %c0_45 = arith.constant 0 : index
    %126 = vector.load %arg10[%c3, %c0_45] : memref<6x32xf32, #tpu.memory_space<vmem>>, vector<1x32xf32>
    %cst_46 = arith.constant dense<0.000000e+00> : vector<8xf32>
    %127 = vector.multi_reduction <add>, %124, %cst_46 [1] : vector<8x32xf32> to vector<8xf32>
    %128 = vector.shape_cast %127 : vector<8xf32> to vector<8x1xf32>
    %cst_47 = arith.constant 3.200000e+01 : f32
    %129 = vector.broadcast %cst_47 : f32 to vector<8x1xf32>
    %130 = arith.divf %128, %129 : vector<8x1xf32>
    %131 = vector.broadcast %130 : vector<8x1xf32> to vector<8x32xf32>
    %132 = arith.subf %124, %131 : vector<8x32xf32>
    %133 = arith.mulf %132, %132 : vector<8x32xf32>
    %cst_48 = arith.constant dense<0.000000e+00> : vector<8xf32>
    %134 = vector.multi_reduction <add>, %133, %cst_48 [1] : vector<8x32xf32> to vector<8xf32>
    %135 = vector.shape_cast %134 : vector<8xf32> to vector<8x1xf32>
    %cst_49 = arith.constant 3.200000e+01 : f32
    %136 = vector.broadcast %cst_49 : f32 to vector<8x1xf32>
    %137 = arith.divf %135, %136 : vector<8x1xf32>
    %138 = vector.broadcast %130 : vector<8x1xf32> to vector<8x32xf32>
    %139 = arith.subf %124, %138 : vector<8x32xf32>
    %cst_50 = arith.constant 9.99999974E-6 : f32
    %140 = vector.broadcast %cst_50 : f32 to vector<8x1xf32>
    %141 = arith.addf %137, %140 : vector<8x1xf32>
    %142 = math.rsqrt %141 : vector<8x1xf32>
    %143 = vector.broadcast %142 : vector<8x1xf32> to vector<8x32xf32>
    %144 = arith.mulf %139, %143 : vector<8x32xf32>
    %145 = vector.broadcast %125 : vector<1x32xf32> to vector<8x32xf32>
    %146 = arith.mulf %144, %145 : vector<8x32xf32>
    %147 = vector.broadcast %126 : vector<1x32xf32> to vector<8x32xf32>
    %148 = arith.addf %146, %147 : vector<8x32xf32>
    %149 = arith.truncf %148 : vector<8x32xf32> to vector<8x32xbf16>
    %c0_51 = arith.constant 0 : index
    %c0_52 = arith.constant 0 : index
    %150 = vector.load %arg7[%c0_51, %c0_52] : memref<32x64xbf16, #tpu.memory_space<vmem>>, vector<32x64xbf16>
    %cst_53 = arith.constant dense<0.000000e+00> : vector<8x64xf32>
    %151 = tpu.matmul %149, %150, %cst_53 {dimension_numbers = #tpu.dot_dimension_numbers<[1], [0], [0], [1], [0, 0, 1, 1], [], []>} : vector<8x32xbf16>, vector<32x64xbf16>, vector<8x64xf32> -> vector<8x64xf32>
    %c0_54 = arith.constant 0 : index
    %c0_55 = arith.constant 0 : index
    %152 = vector.load %arg8[%c0_54, %c0_55] : memref<1x64xf32, #tpu.memory_space<vmem>>, vector<1x64xf32>
    %153 = vector.broadcast %152 : vector<1x64xf32> to vector<8x64xf32>
    %154 = arith.addf %151, %153 : vector<8x64xf32>
    %cst_56 = arith.constant 0.000000e+00 : f32
    %155 = vector.broadcast %cst_56 : f32 to vector<8x64xf32>
    %156 = arith.maximumf %154, %155 : vector<8x64xf32>
    %157 = arith.truncf %156 : vector<8x64xf32> to vector<8x64xbf16>
    %c0_57 = arith.constant 0 : index
    %c0_58 = arith.constant 0 : index
    %158 = vector.load %arg9[%c0_57, %c0_58] : memref<64x32xbf16, #tpu.memory_space<vmem>>, vector<64x32xbf16>
    %cst_59 = arith.constant dense<0.000000e+00> : vector<8x32xf32>
    %159 = tpu.matmul %157, %158, %cst_59 {dimension_numbers = #tpu.dot_dimension_numbers<[1], [0], [0], [1], [0, 0, 1, 1], [], []>} : vector<8x64xbf16>, vector<64x32xbf16>, vector<8x32xf32> -> vector<8x32xf32>
    %c1 = arith.constant 1 : index
    %c0_60 = arith.constant 0 : index
    %160 = vector.load %arg10[%c1, %c0_60] : memref<6x32xf32, #tpu.memory_space<vmem>>, vector<1x32xf32>
    %161 = vector.broadcast %160 : vector<1x32xf32> to vector<8x32xf32>
    %162 = arith.addf %159, %161 : vector<8x32xf32>
    %163 = arith.addf %148, %162 : vector<8x32xf32>
    %c4 = arith.constant 4 : index
    %c0_61 = arith.constant 0 : index
    %164 = vector.load %arg10[%c4, %c0_61] : memref<6x32xf32, #tpu.memory_space<vmem>>, vector<1x32xf32>
    %c5 = arith.constant 5 : index
    %c0_62 = arith.constant 0 : index
    %165 = vector.load %arg10[%c5, %c0_62] : memref<6x32xf32, #tpu.memory_space<vmem>>, vector<1x32xf32>
    %cst_63 = arith.constant dense<0.000000e+00> : vector<8xf32>
    %166 = vector.multi_reduction <add>, %163, %cst_63 [1] : vector<8x32xf32> to vector<8xf32>
    %167 = vector.shape_cast %166 : vector<8xf32> to vector<8x1xf32>
    %cst_64 = arith.constant 3.200000e+01 : f32
    %168 = vector.broadcast %cst_64 : f32 to vector<8x1xf32>
    %169 = arith.divf %167, %168 : vector<8x1xf32>
    %170 = vector.broadcast %169 : vector<8x1xf32> to vector<8x32xf32>
    %171 = arith.subf %163, %170 : vector<8x32xf32>
    %172 = arith.mulf %171, %171 : vector<8x32xf32>
    %cst_65 = arith.constant dense<0.000000e+00> : vector<8xf32>
    %173 = vector.multi_reduction <add>, %172, %cst_65 [1] : vector<8x32xf32> to vector<8xf32>
    %174 = vector.shape_cast %173 : vector<8xf32> to vector<8x1xf32>
    %cst_66 = arith.constant 3.200000e+01 : f32
    %175 = vector.broadcast %cst_66 : f32 to vector<8x1xf32>
    %176 = arith.divf %174, %175 : vector<8x1xf32>
    %177 = vector.broadcast %169 : vector<8x1xf32> to vector<8x32xf32>
    %178 = arith.subf %163, %177 : vector<8x32xf32>
    %cst_67 = arith.constant 9.99999974E-6 : f32
    %179 = vector.broadcast %cst_67 : f32 to vector<8x1xf32>
    %180 = arith.addf %176, %179 : vector<8x1xf32>
    %181 = math.rsqrt %180 : vector<8x1xf32>
    %182 = vector.broadcast %181 : vector<8x1xf32> to vector<8x32xf32>
    %183 = arith.mulf %178, %182 : vector<8x32xf32>
    %184 = vector.broadcast %164 : vector<1x32xf32> to vector<8x32xf32>
    %185 = arith.mulf %183, %184 : vector<8x32xf32>
    %186 = vector.broadcast %165 : vector<1x32xf32> to vector<8x32xf32>
    %187 = arith.addf %185, %186 : vector<8x32xf32>
    %c0_68 = arith.constant 0 : index
    %c0_69 = arith.constant 0 : index
    %c0_70 = arith.constant 0 : index
    %188 = vector.load %arg11[%c0_68, %c0_69, %c0_70] : memref<1x8x32xf32, #tpu.memory_space<vmem>>, vector<1x8x32xf32>
    %189 = vector.shape_cast %188 : vector<1x8x32xf32> to vector<8x32xf32>
    %190 = vector.shape_cast %187 : vector<8x32xf32> to vector<1x8x32xf32>
    tpu.vector_store %arg11[%c0_68, %c0_69, %c0_70], %190 {strides = array<i32>} : memref<1x8x32xf32, #tpu.memory_space<vmem>>, vector<1x8x32xf32>,
    return
  }
  func.func @transform_0(%arg0: i32, %arg1: i32) -> (i32, i32, i32) {
    %c0_i32 = arith.constant 0 : i32
    %c0_i32_0 = arith.constant 0 : i32
    return %arg0, %arg1, %c0_i32 : i32, i32, i32
  }
  func.func @transform_1(%arg0: i32, %arg1: i32) -> (i32, i32, i32) {
    %c0_i32 = arith.constant 0 : i32
    %c0_i32_0 = arith.constant 0 : i32
    %c0_i32_1 = arith.constant 0 : i32
    return %arg0, %c0_i32, %c0_i32_0 : i32, i32, i32
  }
  func.func @transform_2(%arg0: i32, %arg1: i32) -> (i32, i32) {
    %c0_i32 = arith.constant 0 : i32
    %c0_i32_0 = arith.constant 0 : i32
    %c0_i32_1 = arith.constant 0 : i32
    return %c0_i32, %c0_i32_0 : i32, i32
  }
  func.func @transform_3(%arg0: i32, %arg1: i32) -> (i32, i32) {
    %c0_i32 = arith.constant 0 : i32
    %c0_i32_0 = arith.constant 0 : i32
    %c0_i32_1 = arith.constant 0 : i32
    return %c0_i32, %c0_i32_0 : i32, i32
  }
  func.func @transform_4(%arg0: i32, %arg1: i32) -> (i32, i32) {
    %c0_i32 = arith.constant 0 : i32
    %c0_i32_0 = arith.constant 0 : i32
    %c0_i32_1 = arith.constant 0 : i32
    return %c0_i32, %c0_i32_0 : i32, i32
  }
  func.func @transform_5(%arg0: i32, %arg1: i32) -> (i32, i32) {
    %c0_i32 = arith.constant 0 : i32
    %c0_i32_0 = arith.constant 0 : i32
    %c0_i32_1 = arith.constant 0 : i32
    return %c0_i32, %c0_i32_0 : i32, i32
  }
  func.func @transform_6(%arg0: i32, %arg1: i32) -> (i32, i32) {
    %c0_i32 = arith.constant 0 : i32
    %c0_i32_0 = arith.constant 0 : i32
    %c0_i32_1 = arith.constant 0 : i32
    return %c0_i32, %c0_i32_0 : i32, i32
  }
  func.func @transform_7(%arg0: i32, %arg1: i32) -> (i32, i32) {
    %c0_i32 = arith.constant 0 : i32
    %c0_i32_0 = arith.constant 0 : i32
    %c0_i32_1 = arith.constant 0 : i32
    return %c0_i32, %c0_i32_0 : i32, i32
  }
  func.func @transform_8(%arg0: i32, %arg1: i32) -> (i32, i32) {
    %c0_i32 = arith.constant 0 : i32
    %c0_i32_0 = arith.constant 0 : i32
    %c0_i32_1 = arith.constant 0 : i32
    return %c0_i32, %c0_i32_0 : i32, i32
  }
  func.func @transform_9(%arg0: i32, %arg1: i32) -> (i32, i32, i32) {
    %c0_i32 = arith.constant 0 : i32
    %c0_i32_0 = arith.constant 0 : i32
    return %arg0, %arg1, %c0_i32 : i32, i32, i32
  }
}

</mosaic_0001>

<bundles_post_ra>
// kernel: tpu_custom_call.1
= control target key start
LH: loop header
LB: loop body
LE: loop exit
PB: predicated region body
PF: predicated region fallthrough
CT: control target
= control target key end

     0   :  { %s2471_s0 = inlined_call_operand.vmem [shape: f32[2,8,32], index: 0, kind: input, shape index: {}]   ;;  %s2472_s1 = inlined_call_operand.vmem [shape: f32[2,8,32], index: 1, kind: input, shape index: {}]   ;;  %s2473_s2 = inlined_call_operand.vmem [shape: bf16[32,96], index: 2, kind: input, shape index: {}]   ;;  %s2474_s3 = inlined_call_operand.vmem [shape: f32[1,96], index: 3, kind: input, shape index: {}]   ;;  %s2475_s4 = inlined_call_operand.hbm [shape: bf16[32,32], index: 4, kind: input, shape index: {}]   ;;  %s2476_s5 = inlined_call_operand.hbm [shape: bf16[32,64], index: 5, kind: input, shape index: {}]   ;;  %s2477_s6 = inlined_call_operand.vmem [shape: f32[1,64], index: 6, kind: input, shape index: {}]   ;;  %s2478_s7 = inlined_call_operand.vmem [shape: bf16[64,32], index: 7, kind: input, shape index: {}]   ;;  %s2479_s8 = inlined_call_operand.vmem [shape: f32[6,32], index: 8, kind: input, shape index: {}]   ;;  %s2480_s9 = inlined_call_operand.hbm [shape: f32[2,8,32], index: 9, kind: output, shape index: {}]  }
   0x1   :  { %2483 = sst [smem:[#allocation14_spill]] %s2475_s4 }
   0x2   :  { %2484 = sst [smem:[#allocation15_spill]] %s2476_s5 }
   0x3   :  { %14 = vsyncpa [#allocation5], 0 }
   0x4   :  { %15 = vsyncpa [#allocation8], 0 }
   0x5   :  { %16 = vsyncpa [#allocation6], 0 }
   0x6   :  { %18 = vsyncpa [#allocation6 + $0x1], 0  ;;  %s2114_s30 = smov 0   ;;  %s2116_s10 = smov 0  }
   0x7   :  { %s2118_s11 = smov 0   ;;  %s2120_s12 = smov 0  }
   0x8   :  { %s2122_s13 = smov 0   ;;  %s2124_s14 = smov 0  }
   0x9 LB: > { %s1586_s15 = sadd.s32 4294967295, %s2050_s14   ;;  %s1587_s16 = sadd.s32 4294967294, %s2050_s14   ;;  %s2050_s14 = sphi %s2124_s14, %s24_s14   ;;  %s2046_s13 = sphi %s2122_s13, %s2500_s13   ;;  %s2042_s12 = sphi %s2120_s12, %s2499_s12   ;;  %s2038_s11 = sphi %s2118_s11, %s2498_s11   ;;  %s2034_s10 = sphi %s2116_s10, %s2497_s10   ;;  %s2030_s30 = sphi %s2114_s30, %s2496_s30  }
   0xa   : > { %s36_s17 = sadd.s32 1, %s2046_s13  ;;  %s246_s18 = sadd.s32 1, %s2038_s11 }
   0xb   : > { %p38_p0 = scmp.ge.s32.totalorder %s36_s17, 2  ;;  %p256_p1 = scmp.ne.s32.totalorder %s2038_s11, %s2034_s10 }
   0xc   : > { %p257_p2 = scmp.eq.s32.totalorder %s1586_s15, 1  ;;  %p262_p3 = scmp.ne.s32.totalorder %s2034_s10, %s2030_s30 }
   0xd   : > { %s2502_s17 = smov (%p38_p0, %s36_s17), 0  ;;  %p263_p5 = scmp.eq.s32.totalorder %s1587_s16, 1 }
   0xe   : > { %2485 = sst [smem:[#allocation13_spill]] %s2502_s17  ;;  %p2154_p4 = por %p257_p2, %p256_p1 }
   0xf   : > { %s241_s20 = ssub.s32 %s2046_s13, %s2502_s17  ;;  %p1588_p6 = scmp.ge.s32.totalorder %s2050_s14, 1 }
  0x10   : > { %s2486_s19 = scalar_select %p2154_p4, 1, 0 }
  0x11   : > { %p244_p7 = scmp.eq.s32.totalorder %s241_s20, 0  ;;  %p2161_p8 = por %p263_p5, %p262_p3 }
  0x12   : > { %p270_p9 = scmp.lt.s32.totalorder %s2050_s14, 3  ;;  %p2173_p11 = scmp.eq.s32.totalorder %s1586_s15, 0 }
  0x13   : > { %s2487_s21 = scalar_select %p2161_p8, 1, 0 }
  0x14   : > { %s2167_s22 = scalar_select %p244_p7, %s2038_s11, %s246_s18  }
  0x15   : > { %p2169_p10 = pnand %p1588_p6, %p270_p9  ;;  %s2052_s25 = smov [#allocation4]  }
  0x16   : > { %s288_s26 = sshll.u32 %s2052_s25, 4  ;;  %s2053_s28 = smov [#allocation7]   ;;  %s289_s26 = int_to_ptr.vmem [resolvable:$true] %s288_s26 }
  0x17   : > { %p1807_p12 = pneg %p2169_p10  ;;  %s301_s29 = sshll.u32 %s2053_s28, 4  ;;  %s302_s29 = int_to_ptr.vmem [resolvable:$true] %s301_s29 }
  0x18   : > { %s1925_s15 = scalar_lea.vmem %s289_s26, 256  ;;  %p1933_p5 = scmp.lt.s32.totalorder %s289_s26, %s289_s26 }
  0x19   : > { %p2181_p13 = pnand %p2173_p11, %p1807_p12  ;;  %p1926_p1 = scmp.ne.s32.totalorder %s289_s26, %s1925_s15 }
  0x1a   : > { %p1934_p6 = scmp.lt.s32.totalorder %s1925_s15, %s1925_s15 }
  0x1b   : > { %p1916_p0 = pneg %p2181_p13 }
  0x1c   : > { %p1935_p7 = por %p1934_p6, %p1933_p5 }
  0x1d   : > { %p1928_p2 = pnand %p1926_p1, %p1916_p0 }
  0x1f   : > { %p1929_p3 = pneg %p1928_p2 }
  0x21   : > { %p1936_p9 = pnand %p1935_p7, %p1929_p3 }
  0x23   : > { %1939 = shalt.err (!%p1936_p9)
}
  0x24   : > { %s2054_s16 = smov 64   ;;  %s2055_s18 = smov 4  }
  0x25   : > { %s2491_s4 = sld [smem:[#allocation14_spill]]  ;;  %s1951_s28 = scalar_lea.vmem %s302_s29, 256 }
  0x26   : > { %p1952_p12 = scmp.ne.s32.totalorder %s302_s29, %s1951_s28  ;;  %p1959_p8 = scmp.lt.s32.totalorder %s302_s29, %s302_s29 }
  0x27   : > { %p1960_p4 = scmp.lt.s32.totalorder %s1951_s28, %s1951_s28 }
  0x28   : > { %p1954_p1 = pnand %p1952_p12, %p1916_p0 }
  0x29   : > { %p1961_p5 = por %p1960_p4, %p1959_p8 }
  0x2a   : > { %p1955_p2 = pneg %p1954_p1 }
  0x2b   : > { %1810 = dma.hbm_to_vmem [thread:$0]  (!%p2181_p13), %s2491_s4, 256, %s289_s26, [#allocation5], %s2054_s16, %s2054_s16, %s2055_s18  }
  0x2c   : > { %p1962_p3 = pnand %p1961_p5, %p1955_p2 }
  0x2e   : > { %1965 = shalt.err (!%p1962_p3)
}
  0x2f   : > { %s2492_s5 = sld [smem:[#allocation15_spill]] }
  0x31   : > { %343 = sbr.rel (%p2169_p10) target bundleno = 3668 (0xe54), region = 56 }
  0x35   : > { %1813 = dma.hbm_to_vmem [thread:$0]  (!%p2181_p13), %s2492_s5, 256, %s302_s29, [#allocation8], %s2054_s16, %s2054_s16, %s2055_s18  }
  0x36   : > { %2017 = dma.done.wait (%p2173_p11), [#allocation5], 256  }
  0x37   : > { %2019 = vsyncadd (%p2173_p11), [#allocation5], 4294967040 }
  0x38   : > { %2021 = dma.done.wait (%p2173_p11), [#allocation8], 256  }
  0x39   : > { %2023 = vsyncadd (%p2173_p11), [#allocation8], 4294967040  ;;  %p389_p4 = scmp.lt.s32.totalorder %s2042_s12, 1  ;;  %v2056_v0 = vmov 0.0   ;;  %vm2057_vm0 = vmmov 0   ;;  %v1882_v1 = vld [vmem:[%s2473_s2 + $0x8] sm:$0xff]   ;;  %v604_v38 = vlaneseq }
  0x3a   : > { %1681 = vmatprep.subr.bf16.mxu1 %v2056_v0  ;;  %1685 = vmatprep.mubr.msk.bf16.mxu1 %vm2057_vm0, %v2056_v0  ;;  %s2058_s18 = smov 96   ;;  %v1883_v2 = vld [vmem:[%s2473_s2] sm:$0xff]   ;;  %v1884_v3 = vld [vmem:[%s2473_s2 + $0x8] sm:$0xff]   ;;  %s2059_s26 = smov 64   ;;  %vm436_vm1 = vcmask 261120   ;;  %vm530_vm2 = vcmask 257024  }
  0x3b   : > { %1697 = vmatprep.subr.bf16.mxu0 %v2056_v0  ;;  %1701 = vmatprep.mubr.msk.bf16.mxu0 %vm2057_vm0, %v2056_v0  ;;  %s390_s17 = scalar_select %p389_p4, %s2042_s12, 1  ;;  %v1885_v4 = vld [vmem:[%s2473_s2] sm:$0xff]   ;;  %vm619_vm3 = vcmask 64512   ;;  %v2287_v39 = vshrl.u32 %v604_v38, 7  ;;  %v2289_v40 = vand.u32 127, %v604_v38  ;;  %vm682_vm5 = vcmask 1043456  }
  0x3c   : > { %429 = vrot.lane.b32.xlu0 %v1882_v1, %s2058_s18  ;;  %v2241_v6 = vld [vmem:[%s2474_s3] ss:$0 sm:$0xff]  ;;  %1698 = vmatpush3.bf16.msra.mxu0 %v1884_v3  ;;  %s2061_s29 = smov 112   ;;  %vm1395_vm6 = vcmask 523264   ;;  %s386_s15 = sand.u32 1, %s2034_s10  }
  0x3d   : > { %s1596_s24 = sshll.u32 %s390_s17, 3  ;;  %433 = vrot.lane.b32.xlu1 %v2241_v6, %s2058_s18  ;;  %1699 = vmatprep.subr.bf16.mxu0 %v2056_v0  ;;  %vm610_vm4 = vcmp.le.s32.totalorder %v2289_v40, %v2287_v39  ;;  %s1595_s17 = sshll.u32 %s386_s15, 3 }
  0x3e   : > { %s395_s16 = scalar_lea.vmem %s2471_s0, %s1596_s24  ;;  %s399_s27 = scalar_lea.vmem %s2472_s1, %s1596_s24 }
  0x3f   : > { %v2236_v5 = vld [vmem:[%s395_s16] sm:$0xff]  ;;  %s2060_s24 = smov 120   ;;  %s2062_s16 = smov 104  }
  0x40   : > { %427 = vrot.lane.b32.xlu0 %v1883_v2, %s2058_s18  ;;  %v535_v7 = vpack.c.bf16 %v2236_v5, %v2236_v5  ;;  %1700 = vmatpush3.bf16.msra.mxu0 %v1885_v4  ;;  %v405_v9 = vld [vmem:[%s399_s27] sm:$0xff]  ;;  %s1637_s27 = sshll.u32 %s2042_s12, 7  ;;  %s1467_s25 = scalar_lea.sflag [#allocation6], %s386_s15 }
  0x41   : > { %482 = vrot.lane.b32.xlu1 %v1882_v1, %s2059_s26  ;;  %1711 = vmatprep.subr.bf16.mxu0 %v2056_v0  ;;  %v406_v11 = vpack.c.bf16 %v405_v9, %v405_v9  ;;  %s1479_s20 = scalar_lea.hbm %s2480_s9, %s1637_s27  ;;  %p2493_p10 = scmp.ne.s32.totalorder %s2486_s19, 0 }
  0x42   : > { %s2063_s23 = smov [#allocation9]  }
  0x43   : > { %1702 = vmatmul.mubr.msk.bf16.vlgmr.msra.gmra.mxu0 %vm436_vm1, %v535_v7 }
  0x44   : > { %480 = vrot.lane.b32.xlu0 %v1883_v2, %s2059_s26  ;;  %1713 = vmatprep.mubr.msk.bf16.mxu0 %vm2057_vm0, %v2056_v0 }
  0xae   : > { %v430_v8 = vpop.permute.xlu0 %429 }
  0xaf   : > { %1682 = vmatpush3.bf16.msra.mxu1 %v430_v8  ;;  %v434_v12 = vpop.permute.xlu1 %433 }
  0xb0   : > { %1683 = vmatprep.subr.bf16.mxu1 %v2056_v0 }
  0xb2   : > { %v428_v10 = vpop.permute.xlu0 %427 }
  0xb3   : > { %1684 = vmatpush3.bf16.msra.mxu1 %v428_v10  ;;  %v483_v13 = vpop.permute.xlu1 %482 }
  0xb4   : > { %1689 = vmatprep.subr.bf16.mxu1 %v2056_v0 }
  0xb6   : > { %1686 = vmatmul.mubr.msk.bf16.vlgmr.msra.gmra.mxu1 %vm436_vm1, %v406_v11  ;;  %v481_v14 = vpop.permute.xlu0 %480 }
  0xb7   : > { %1693 = vmatprep.mubr.msk.bf16.mxu1 %vm2057_vm0, %v2056_v0  ;;  %1690 = vmatpush3.bf16.msra.mxu1 %v483_v13 }
  0xb8   : > { %1691 = vmatprep.subr.bf16.mxu1 %v2056_v0 }
  0xbb   : > { %1692 = vmatpush3.bf16.msra.mxu1 %v481_v14 }
  0xbc   : > { %1705 = vmatprep.subr.bf16.mxu1 %v2056_v0 }
  0xbe   : > { %1694 = vmatmul.mubr.msk.bf16.vlgmr.msra.gmra.mxu1 %vm436_vm1, %v406_v11  ;;  %v614_v11 = vld [vmem:[#allocation4 + $0x4] sm:$0xf] }
  0xbf   : > { %1707 = vmatprep.mubr.msk.bf16.mxu1 %vm2057_vm0, %v2056_v0 }
 0x103   : > { %v597_v15 = vpop.f32.mrf.mxu0 }
 0x104   : > { %v598_v16 = vadd.f32 %v2241_v6, %v597_v15 }
 0x105   : > { %v1703_v17 = vpop.f32.mrf.mxu0 }
 0x106   : > { %v617_v18 = vmul.f32 0.35355338, %v598_v16  ;;  %v613_v17 = vld [vmem:[#allocation4] sm:$0xf] }
 0x107   : > { %v600_v19 = vpop.f32.mrf.mxu0 }
 0x108   : > { %v2267_v20 = vpack.c.bf16 %v617_v18, %v617_v18 }
 0x109   : > { %v1704_v21 = vpop.f32.mrf.mxu0 }
 0x10a   : > { %728 = vrot.lane.b32.xlu0 %v2267_v20, %s2060_s24  ;;  %v896_v21 = vsel %vm682_vm5, %v613_v17, 0 }
 0x176   : > { %v474_v22 = vpop.f32.mrf.mxu1 }
 0x177   : > { %v475_v23 = vadd.f32 %v474_v22, %v434_v12  ;;  %v850_v12 = vsel %vm682_vm5, %v614_v11, 0 }
 0x178   : > { %v1687_v24 = vpop.f32.mrf.mxu1 }
 0x179   : > { %v529_v25 = vpack.c.bf16 %v475_v23, %v475_v23 }
 0x17a   : > { %v477_v26 = vpop.f32.mrf.mxu1 }
 0x17b   : > { %531 = vst.msk [vmem:[#allocation2] sm:$0xf] %vm530_vm2, %v529_v25 }
 0x17c   : > { %v1688_v27 = vpop.f32.mrf.mxu1  ;;  %v729_v37 = vpop.permute.xlu0 %728 }
 0x17e   : > { %v523_v31 = vpop.f32.mrf.mxu1 }
 0x180   : > { %v1695_v32 = vpop.f32.mrf.mxu1 }
 0x182   : > { %v611_v28 = vld [vmem:[#allocation2] sm:$0xf]  ;;  %v526_v33 = vpop.f32.mrf.mxu1 }
 0x183   : > { %v624_v29 = vsel %vm619_vm3, %v611_v28, 0  ;;  %v2273_v30 = vcombine.low %v611_v28, %v611_v28 }
 0x184   : > { %1706 = vmatpush3.bf16.xpose.msra.mxu1 %v624_v29  ;;  %v1696_v34 = vpop.f32.mrf.mxu1 }
 0x185   : > { %733 = vrot.lane.b32.xlu1 %v2273_v30, %s2060_s24  ;;  %1717 = vmatprep.subr.bf16.mxu1 %v2056_v0 }
 0x18b   : > { %1708 = vmatmul.mubr.msk.bf16.vlgmr.msra.gmra.mxu1 %vm619_vm3, %v2267_v20 }
 0x18c   : > { %1719 = vmatprep.mubr.msk.bf16.mxu1 %vm2057_vm0, %v2056_v0 }
 0x1f7   : > { %v734_v35 = vpop.permute.xlu1 %733 }
 0x1f8   : > { %v739_v36 = vsel %vm619_vm3, %v734_v35, 0 }
 0x1f9   : > { %1718 = vmatpush3.bf16.xpose.msra.mxu1 %v739_v36 }
 0x1fa   : > { %1729 = vmatprep.subr.bf16.mxu1 %v2056_v0 }
 0x200   : > { %1720 = vmatmul.mubr.msk.bf16.vlgmr.msra.gmra.mxu1 %vm619_vm3, %v729_v37 }
 0x201   : > { %1731 = vmatprep.mubr.msk.bf16.mxu1 %vm2057_vm0, %v2056_v0  ;;  %1730 = vmatpush3.bf16.msra.mxu1 %v850_v12 }
 0x202   : > { %1741 = vmatprep.subr.bf16.mxu1 %v2056_v0 }
 0x24b   : > { %v660_v41 = vpop.f32.mrf.mxu1 }
 0x24c   : > { %v666_v42 = vsel %vm610_vm4, %v660_v41, -1e+30 }
 0x24d   : > { %v1709_v43 = vpop.f32.mrf.mxu1  ;;  %v667_v44 = vsel %vm619_vm3, %v666_v42, -inf }
 0x24e   : > { %668 = vmax.xlane.f32.xlu1 %v667_v44 }
 0x24f   : > { %v663_v45 = vpop.f32.mrf.mxu1 }
 0x251   : > { %v1710_v46 = vpop.f32.mrf.mxu1 }
 0x2c0   : > { %v775_v47 = vpop.f32.mrf.mxu1 }
 0x2c1   : > { %v781_v48 = vsel %vm610_vm4, %v775_v47, -1e+30 }
 0x2c2   : > { %v1721_v49 = vpop.f32.mrf.mxu1  ;;  %v782_v50 = vsel %vm619_vm3, %v781_v48, -inf }
 0x2c3   : > { %783 = vmax.xlane.f32.xlu0 %v782_v50 }
 0x2c4   : > { %v778_v51 = vpop.f32.mrf.mxu1 }
 0x2c6   : > { %v1722_v52 = vpop.f32.mrf.mxu1 }
 0x2d7   : > { %v669_v53 = vpop.xlane.xlu1 %668 }
 0x2d8   : > { %v670_v54 = vsub.f32 %v666_v42, %v669_v53 }
 0x2d9   : > { %486 = vrot.lane.b32.xlu0 %v2241_v6, %s2059_s26  ;;  %s1970_s26 = sshll.u32 %s2063_s23, 4  ;;  %s1971_s26 = int_to_ptr.vmem [resolvable:$false] %s1970_s26 }
 0x2da   : > { %v671_v55 = vmul.f32 1.442695, %v670_v54  ;;  %s1972_s12 = scalar_lea.vmem %s1971_s26, 256 }
 0x2dc   : > { %1894 = vpow2.f32 %v671_v55 }
 0x2dd   : > { %940 = vrot.lane.b32.xlu0 %v2273_v30, %s2061_s29 }
 0x2e1   : > { %938 = vrot.lane.b32.xlu0 %v2267_v20, %s2061_s29 }
 0x2e9   : > { %v1895_v56 = vpop.eup %1894 }
 0x2ea   : > { %v673_v57 = vsel %vm619_vm3, %v1895_v56, 0.0 }
 0x2eb   : > { %674 = vadd.xlane.f32.xlu1 %v673_v57 }
 0x34c   : > { %v784_v58 = vpop.xlane.xlu0 %783 }
 0x34d   : > { %v785_v59 = vsub.f32 %v781_v48, %v784_v58 }
 0x34f   : > { %v786_v60 = vmul.f32 1.442695, %v785_v59 }
 0x350   : > { %v487_v61 = vpop.permute.xlu0 %486 }
 0x351   : > { %1896 = vpow2.f32 %v786_v60  ;;  %v524_v62 = vadd.f32 %v523_v31, %v487_v61 }
 0x353   : > { %v532_v63 = vpack.c.bf16 %v524_v62, %v524_v62 }
 0x354   : > { %v941_v27 = vpop.permute.xlu0 %940 }
 0x355   : > { %533 = vst.msk [vmem:[#allocation3] sm:$0xf] %vm530_vm2, %v532_v63  ;;  %v946_v32 = vsel %vm619_vm3, %v941_v27, 0 }
 0x358   : > { %v939_v35 = vpop.permute.xlu0 %938 }
 0x35c   : > { %v612_v1 = vld [vmem:[#allocation3] sm:$0xf] }
 0x35d   : > { %v684_v2 = vsel %vm682_vm5, %v612_v1, 0  ;;  %v2312_v6 = vcombine.low %v612_v1, %v612_v1  ;;  %v615_v1 = vld [vmem:[#allocation4 + $0x8] sm:$0xf] }
 0x35e   : > { %v1897_v3 = vpop.eup %1896  ;;  %1712 = vmatpush3.bf16.msra.mxu0 %v684_v2  ;;  %v1054_v2 = vsel %vm682_vm5, %v615_v1, 0 }
 0x35f   : > { %v788_v4 = vsel %vm619_vm3, %v1897_v3, 0.0  ;;  %1723 = vmatprep.subr.bf16.mxu0 %v2056_v0 }
 0x360   : > { %789 = vadd.xlane.f32.xlu1 %v788_v4 }
 0x371   : > { %797 = vrot.lane.b32.xlu1 %v2312_v6, %s2060_s24  ;;  %s388_s24 = scalar_lea.vmem [#allocation9], %s1595_s17 }
 0x374   : > { %v675_v7 = vpop.xlane.xlu1 %674 }
 0x375   : > { %1898 = vrcp.f32 %v675_v7 }
 0x382   : > { %v1899_v8 = vpop.eup %1898 }
 0x383   : > { %v677_v9 = vmul.f32 %v1899_v8, %v1895_v56 }
 0x385   : > { %v678_v10 = vpack.c.bf16 %v677_v9, %v677_v9 }
 0x387   : > { %1714 = vmatmul.mubr.msk.bf16.vlgmr.msra.gmra.mxu0 %vm619_vm3, %v678_v10 }
 0x388   : > { %1725 = vmatprep.mubr.msk.bf16.mxu0 %vm2057_vm0, %v2056_v0 }
 0x3e9   : > { %v790_v13 = vpop.xlane.xlu1 %789 }
 0x3ea   : > { %1900 = vrcp.f32 %v790_v13 }
 0x3ed   : > { %v798_v14 = vpop.permute.xlu1 %797 }
 0x3ee   : > { %v803_v15 = vsel %vm682_vm5, %v798_v14, 0 }
 0x3ef   : > { %1724 = vmatpush3.bf16.msra.mxu0 %v803_v15 }
 0x3f0   : > { %1735 = vmatprep.subr.bf16.mxu0 %v2056_v0 }
 0x3f7   : > { %v1901_v16 = vpop.eup %1900 }
 0x3f8   : > { %v792_v18 = vmul.f32 %v1901_v16, %v1897_v3 }
 0x3fa   : > { %v793_v19 = vpack.c.bf16 %v792_v18, %v792_v18 }
 0x3fc   : > { %1726 = vmatmul.mubr.msk.bf16.vlgmr.msra.gmra.mxu0 %vm619_vm3, %v793_v19 }
 0x3fd   : > { %1736 = vmatpush3.bf16.msra.mxu0 %v896_v21  ;;  %1737 = vmatprep.mubr.msk.bf16.mxu0 %vm2057_vm0, %v2056_v0 }
 0x3fe   : > { %1747 = vmatprep.subr.bf16.mxu0 %v2056_v0 }
 0x447   : > { %v720_v22 = vpop.f32.mrf.mxu0 }
 0x448   : > { %v726_v23 = vpack.c.bf16 %v720_v22, %v720_v22 }
 0x449   : > { %v1715_v24 = vpop.f32.mrf.mxu0 }
 0x44a   : > { %1738 = vmatmul.mubr.msk.bf16.vlgmr.msra.gmra.mxu0 %vm619_vm3, %v726_v23 }
 0x44b   : > { %v723_v25 = vpop.f32.mrf.mxu0  ;;  %1749 = vmatprep.mubr.msk.bf16.mxu0 %vm2057_vm0, %v2056_v0 }
 0x44d   : > { %v1716_v26 = vpop.f32.mrf.mxu0 }
 0x4bc   : > { %v839_v28 = vpop.f32.mrf.mxu0 }
 0x4bd   : > { %v845_v29 = vpack.c.bf16 %v839_v28, %v839_v28 }
 0x4be   : > { %v1727_v31 = vpop.f32.mrf.mxu0 }
 0x4bf   : > { %1732 = vmatmul.mubr.msk.bf16.vlgmr.msra.gmra.mxu1 %vm619_vm3, %v845_v29 }
 0x4c0   : > { %1742 = vmatpush3.bf16.xpose.msra.mxu1 %v946_v32  ;;  %v842_v33 = vpop.f32.mrf.mxu0  ;;  %1743 = vmatprep.mubr.msk.bf16.mxu1 %vm2057_vm0, %v2056_v0 }
 0x4c1   : > { %1753 = vmatprep.subr.bf16.mxu1 %v2056_v0 }
 0x4c2   : > { %v1728_v34 = vpop.f32.mrf.mxu0 }
 0x4c7   : > { %1744 = vmatmul.mubr.msk.bf16.vlgmr.msra.gmra.mxu1 %vm619_vm3, %v939_v35 }
 0x4c8   : > { %1755 = vmatprep.mubr.msk.bf16.mxu1 %vm2057_vm0, %v2056_v0  ;;  %1754 = vmatpush3.bf16.msra.mxu1 %v1054_v2 }
 0x4c9   : > { %1765 = vmatprep.subr.bf16.mxu1 %v2056_v0 }
 0x50a   : > { %v2339_v36 = vpop.f32.mrf.mxu0 }
 0x50c   : > { %v1739_v37 = vpop.f32.mrf.mxu0 }
 0x50e   : > { %v935_v38 = vpop.f32.mrf.mxu0 }
 0x510   : > { %v1740_v41 = vpop.f32.mrf.mxu0 }
 0x57f   : > { %v2341_v42 = vpop.f32.mrf.mxu1 }
 0x580   : > { %v933_v22 = vadd.f32 %v2339_v36, %v2341_v42  ;;  %v1621_v42 = vld [vmem:[%s2479_s8] ss:$0 sm:$0xff] }
 0x581   : > { %v1733_v43 = vpop.f32.mrf.mxu1 }
 0x583   : > { %v889_v44 = vpop.f32.mrf.mxu1 }
 0x585   : > { %v1734_v45 = vpop.f32.mrf.mxu1 }
 0x587   : > { %v982_v46 = vpop.f32.mrf.mxu1 }
 0x588   : > { %v988_v47 = vsel %vm610_vm4, %v982_v46, -1e+30 }
 0x589   : > { %v1745_v48 = vpop.f32.mrf.mxu1  ;;  %v989_v49 = vsel %vm619_vm3, %v988_v47, -inf }
 0x58a   : > { %990 = vmax.xlane.f32.xlu1 %v989_v49 }
 0x58b   : > { %v985_v50 = vpop.f32.mrf.mxu1 }
 0x58d   : > { %v1746_v51 = vpop.f32.mrf.mxu1 }
 0x59b   : > { %1099 = vrot.lane.b32.xlu1 %v2273_v30, %s2062_s16 }
 0x59f   : > { %1097 = vrot.lane.b32.xlu1 %v2267_v20, %s2062_s16 }
 0x613   : > { %v991_v52 = vpop.xlane.xlu1 %990 }
 0x614   : > { %v992_v53 = vsub.f32 %v988_v47, %v991_v52 }
 0x616   : > { %v993_v54 = vmul.f32 1.442695, %v992_v53 }
 0x617   : > { %v1100_v60 = vpop.permute.xlu1 %1099 }
 0x618   : > { %1902 = vpow2.f32 %v993_v54  ;;  %v1105_v62 = vsel %vm619_vm3, %v1100_v60, 0  ;;  %v1622_v60 = vld [vmem:[%s2479_s8 + $0x2] ss:$0 sm:$0xff] }
 0x61b   : > { %v1098_v63 = vpop.permute.xlu1 %1097 }
 0x625   : > { %v1903_v55 = vpop.eup %1902 }
 0x626   : > { %v995_v56 = vsel %vm619_vm3, %v1903_v55, 0.0 }
 0x627   : > { %996 = vadd.xlane.f32.xlu0 %v995_v56  ;;  %v1889_v56 = vld [vmem:[#allocation7] sm:$0xff]  }
 0x63d   : > { %1001 = vrot.lane.b32.xlu0 %v2312_v6, %s2061_s29  ;;  %s1481_s29 = sshll.u32 %s388_s24, 4  ;;  %s1482_s29 = int_to_ptr.vmem [resolvable:$true] %s1481_s29 }
 0x63e   : > { %s1966_s28 = scalar_lea.vmem %s1482_s29, 128  ;;  %p1973_p0 = scmp.lt.s32.totalorder %s1482_s29, %s1971_s26 }
 0x63f   : > { %p1967_p8 = scmp.ne.s32.totalorder %s1482_s29, %s1966_s28  ;;  %p1974_p6 = scmp.lt.s32.totalorder %s1972_s12, %s1966_s28 }
 0x641   : > { %p1968_p11 = pnand %p1967_p8, %p2493_p10  ;;  %p1975_p7 = por %p1974_p6, %p1973_p0 }
 0x643   : > { %p1969_p13 = pneg %p1968_p11 }
 0x645   : > { %p1976_p9 = pnand %p1975_p7, %p1969_p13 }
 0x6b0   : > { %v997_v57 = vpop.xlane.xlu0 %996 }
 0x6b1   : > { %1904 = vrcp.f32 %v997_v57  ;;  %v1891_v57 = vld [vmem:[%s2478_s7 + $0x10] sm:$0xff]  }
 0x6b4   : > { %v1002_v58 = vpop.permute.xlu0 %1001 }
 0x6b5   : > { %v1007_v59 = vsel %vm682_vm5, %v1002_v58, 0 }
 0x6b6   : > { %1748 = vmatpush3.bf16.msra.mxu0 %v1007_v59 }
 0x6b7   : > { %1759 = vmatprep.subr.bf16.mxu0 %v2056_v0 }
 0x6be   : > { %v1905_v20 = vpop.eup %1904 }
 0x6bf   : > { %v999_v30 = vmul.f32 %v1905_v20, %v1903_v55  ;;  %v1888_v55 = vld [vmem:[#allocation7 + $0x8] sm:$0xff]  }
 0x6c1   : > { %v1000_v61 = vpack.c.bf16 %v999_v30, %v999_v30 }
 0x6c3   : > { %1750 = vmatmul.mubr.msk.bf16.vlgmr.msra.gmra.mxu0 %vm619_vm3, %v1000_v61 }
 0x6c4   : > { %1760 = vmatpush3.bf16.xpose.msra.mxu0 %v1105_v62  ;;  %1761 = vmatprep.mubr.msk.bf16.mxu0 %vm2057_vm0, %v2056_v0  ;;  %v1623_v62 = vld [vmem:[%s2479_s8 + $0x3] ss:$0 sm:$0xff] }
 0x6c5   : > { %1771 = vmatprep.subr.bf16.mxu0 %v2056_v0 }
 0x6cb   : > { %1762 = vmatmul.mubr.msk.bf16.vlgmr.msra.gmra.mxu0 %vm619_vm3, %v1098_v63 }
 0x6cc   : > { %1773 = vmatprep.mubr.msk.bf16.mxu0 %vm2057_vm0, %v2056_v0 }
 0x783   : > { %v1043_v3 = vpop.f32.mrf.mxu0 }
 0x784   : > { %v1049_v4 = vpack.c.bf16 %v1043_v3, %v1043_v3  ;;  %v1892_v3 = vld [vmem:[%s2478_s7 + $0x8] sm:$0xff]  }
 0x785   : > { %v1751_v7 = vpop.f32.mrf.mxu0 }
 0x786   : > { %1756 = vmatmul.mubr.msk.bf16.vlgmr.msra.gmra.mxu1 %vm619_vm3, %v1049_v4  ;;  %v1893_v4 = vld [vmem:[%s2478_s7] sm:$0xff]  }
 0x787   : > { %v1046_v8 = vpop.f32.mrf.mxu0  ;;  %1767 = vmatprep.mubr.msk.bf16.mxu1 %vm2057_vm0, %v2056_v0  ;;  %v1624_v7 = vld [vmem:[%s2477_s6] ss:$0 sm:$0xff] }
 0x789   : > { %v1752_v9 = vpop.f32.mrf.mxu0 }
 0x78b   : > { %v1141_v10 = vpop.f32.mrf.mxu0 }
 0x78c   : > { %v1147_v11 = vsel %vm610_vm4, %v1141_v10, -1e+30 }
 0x78d   : > { %v1763_v12 = vpop.f32.mrf.mxu0  ;;  %v1148_v13 = vsel %vm619_vm3, %v1147_v11, -inf }
 0x78e   : > { %1149 = vmax.xlane.f32.xlu0 %v1148_v13 }
 0x78f   : > { %v1144_v14 = vpop.f32.mrf.mxu0 }
 0x791   : > { %v1764_v15 = vpop.f32.mrf.mxu0 }
 0x7a4   : > { %1160 = vrot.lane.b32.xlu0 %v2312_v6, %s2062_s16  ;;  %v616_v6 = vld [vmem:[#allocation4 + $0xc] sm:$0xf] }
 0x7a5   : > { %v1213_v26 = vsel %vm682_vm5, %v616_v6, 0 }
 0x7a6   : > { %1772 = vmatpush3.bf16.msra.mxu0 %v1213_v26 }
 0x7a7   : > { %1785 = vmatprep.subr.bf16.mxu0 %v2056_v0 }
 0x817   : > { %v1150_v16 = vpop.xlane.xlu0 %1149 }
 0x818   : > { %v1151_v17 = vsub.f32 %v1147_v11, %v1150_v16 }
 0x81a   : > { %v1152_v18 = vmul.f32 1.442695, %v1151_v17 }
 0x81b   : > { %v1161_v19 = vpop.permute.xlu0 %1160 }
 0x81c   : > { %1906 = vpow2.f32 %v1152_v18  ;;  %v1166_v21 = vsel %vm682_vm5, %v1161_v19, 0 }
 0x81d   : > { %1766 = vmatpush3.bf16.msra.mxu1 %v1166_v21 }
 0x81e   : > { %1777 = vmatprep.subr.bf16.mxu1 %v2056_v0 }
 0x829   : > { %v1907_v39 = vpop.eup %1906 }
 0x82a   : > { %v1154_v40 = vsel %vm619_vm3, %v1907_v39, 0.0 }
 0x82b   : > { %1155 = vadd.xlane.f32.xlu1 %v1154_v40 }
 0x846   : > { %v1090_v23 = vpop.f32.mrf.mxu1 }
 0x847   : > { %v1096_v24 = vadd.f32 %v1090_v23, %v933_v22 }
 0x848   : > { %v1757_v25 = vpop.f32.mrf.mxu1 }
 0x84a   : > { %v1093_v27 = vpop.f32.mrf.mxu1 }
 0x84c   : > { %v1758_v28 = vpop.f32.mrf.mxu1 }
 0x8b4   : > { %v1156_v29 = vpop.xlane.xlu1 %1155 }
 0x8b5   : > { %1908 = vrcp.f32 %v1156_v29  ;;  %v1634_v29 = vld [vmem:[%s2479_s8 + $0x4] ss:$0 sm:$0xff] }
 0x8c2   : > { %v1909_v31 = vpop.eup %1908 }
 0x8c3   : > { %v1158_v32 = vmul.f32 %v1909_v31, %v1907_v39 }
 0x8c5   : > { %v1159_v33 = vpack.c.bf16 %v1158_v32, %v1158_v32  ;;  %v1635_v32 = vld [vmem:[%s2479_s8 + $0x5] ss:$0 sm:$0xff] }
 0x8c7   : > { %1768 = vmatmul.mubr.msk.bf16.vlgmr.msra.gmra.mxu1 %vm619_vm3, %v1159_v33 }
 0x8c8   : > { %1781 = vmatprep.mubr.msk.bf16.mxu1 %vm2057_vm0, %v2056_v0  ;;  %1778 = vmatpush3.bf16.msra.mxu1 %v1888_v55 }
 0x8c9   : > { %1779 = vmatprep.subr.bf16.mxu1 %v2056_v0 }
 0x8cc   : > { %1780 = vmatpush3.bf16.msra.mxu1 %v1889_v56 }
 0x987   : > { %v1202_v34 = vpop.f32.mrf.mxu1 }
 0x988   : > { %v1208_v35 = vpack.c.bf16 %v1202_v34, %v1202_v34 }
 0x989   : > { %v1769_v36 = vpop.f32.mrf.mxu1 }
 0x98a   : > { %1774 = vmatmul.mubr.msk.bf16.vlgmr.msra.gmra.mxu0 %vm619_vm3, %v1208_v35 }
 0x98b   : > { %v1205_v37 = vpop.f32.mrf.mxu1  ;;  %1793 = vmatprep.mubr.msk.bf16.mxu0 %vm2057_vm0, %v2056_v0 }
 0x98d   : > { %v1770_v38 = vpop.f32.mrf.mxu1 }
 0xa4a   : > { %v1249_v41 = vpop.f32.mrf.mxu0 }
 0xa4b   : > { %v1255_v43 = vadd.f32 %v1249_v41, %v1096_v24 }
 0xa4c   : > { %v1775_v44 = vpop.f32.mrf.mxu0 }
 0xa4d   : > { %v1261_v45 = vadd.f32 %v1621_v42, %v1255_v43 }
 0xa4e   : > { %v1252_v46 = vpop.f32.mrf.mxu0 }
 0xa4f   : > { %v1262_v47 = vadd.f32 %v1261_v45, %v2236_v5  ;;  %v1890_v5 = vld [vmem:[%s2478_s7 + $0x18] sm:$0xff]  }
 0xa50   : > { %v1776_v48 = vpop.f32.mrf.mxu0  ;;  %1786 = vmatpush3.bf16.msra.mxu0 %v1890_v5 }
 0xa51   : > { %v1265_v49 = vsel %vm436_vm1, %v1262_v47, 0.0  ;;  %1787 = vmatprep.subr.bf16.mxu0 %v2056_v0 }
 0xa52   : > { %1266 = vadd.xlane.f32.xlu1 %v1265_v49 }
 0xa54   : > { %1788 = vmatpush3.bf16.msra.mxu0 %v1891_v57 }
 0xa55   : > { %1789 = vmatprep.subr.bf16.mxu0 %v2056_v0 }
 0xa58   : > { %1790 = vmatpush3.bf16.msra.mxu0 %v1892_v3 }
 0xa59   : > { %1791 = vmatprep.subr.bf16.mxu0 %v2056_v0  ;;  %v1628_v0 = vld [vmem:[%s2479_s8 + $0x1] ss:$0 sm:$0xff] }
 0xa5c   : > { %1792 = vmatpush3.bf16.msra.mxu0 %v1893_v4 }
 0xadb   : > { %v1267_v50 = vpop.xlane.xlu1 %1266 }
 0xadc   : > { %v1269_v51 = vmul.f32 0.03125, %v1267_v50 }
 0xade   : > { %v1270_v52 = vsub.f32 %v1262_v47, %v1269_v51 }
 0xae0   : > { %v1271_v53 = vmul.f32 %v1270_v52, %v1270_v52 }
 0xae2   : > { %v1272_v54 = vsel %vm436_vm1, %v1271_v53, 0.0 }
 0xae3   : > { %1273 = vadd.xlane.f32.xlu1 %v1272_v54 }
 0xb6c   : > { %v1274_v58 = vpop.xlane.xlu1 %1273 }
 0xb6d   : > { %v1275_v59 = vmul.f32 0.03125, %v1274_v58 }
 0xb6f   : > { %v1276_v20 = vadd.f32 1e-05, %v1275_v59 }
 0xb71   : > { %1910 = vrsqrt.f32 %v1276_v20 }
 0xb7e   : > { %v1911_v30 = vpop.eup %1910 }
 0xb7f   : > { %v1278_v61 = vmul.f32 %v1911_v30, %v1270_v52 }
 0xb81   : > { %v1283_v63 = vmul.f32 %v1622_v60, %v1278_v61 }
 0xb83   : > { %v1288_v1 = vadd.f32 %v1623_v62, %v1283_v63 }
 0xb85   : > { %v1289_v2 = vpack.c.bf16 %v1288_v1, %v1288_v1 }
 0xb87   : > { %1782 = vmatmul.mubr.msk.bf16.vlgmr.msra.gmra.mxu1 %vm436_vm1, %v1289_v2 }
 0xc47   : > { %v1350_v8 = vpop.f32.mrf.mxu1 }
 0xc48   : > { %v1351_v9 = vadd.f32 %v1624_v7, %v1350_v8 }
 0xc49   : > { %v1783_v10 = vpop.f32.mrf.mxu1 }
 0xc4a   : > { %v1356_v11 = vmax.f32 %v1351_v9, 0.0 }
 0xc4b   : > { %v1353_v12 = vpop.f32.mrf.mxu1 }
 0xc4c   : > { %v1357_v13 = vpack.c.bf16 %v1356_v11, %v1356_v11 }
 0xc4d   : > { %v1784_v14 = vpop.f32.mrf.mxu1 }
 0xc4e   : > { %1794 = vmatmul.mubr.msk.bf16.vlgmr.msra.gmra.mxu0 %vm1395_vm6, %v1357_v13 }
 0xd0e   : > { %v1433_v15 = vpop.f32.mrf.mxu0 }
 0xd0f   : > { %v1434_v16 = vadd.f32 %v1628_v0, %v1433_v15 }
 0xd10   : > { %v1795_v17 = vpop.f32.mrf.mxu0 }
 0xd11   : > { %v1439_v18 = vadd.f32 %v1434_v16, %v1288_v1 }
 0xd12   : > { %v1436_v19 = vpop.f32.mrf.mxu0 }
 0xd13   : > { %v1442_v21 = vsel %vm436_vm1, %v1439_v18, 0.0 }
 0xd14   : > { %1443 = vadd.xlane.f32.xlu1 %v1442_v21  ;;  %v1796_v39 = vpop.f32.mrf.mxu0 }
 0xd9d   : > { %v1444_v40 = vpop.xlane.xlu1 %1443 }
 0xd9e   : > { %v1445_v22 = vmul.f32 0.03125, %v1444_v40 }
 0xda0   : > { %v1446_v23 = vsub.f32 %v1439_v18, %v1445_v22 }
 0xda2   : > { %v1447_v24 = vmul.f32 %v1446_v23, %v1446_v23 }
 0xda4   : > { %v1448_v6 = vsel %vm436_vm1, %v1447_v24, 0.0 }
 0xda5   : > { %1449 = vadd.xlane.f32.xlu1 %v1448_v6 }
 0xe2e   : > { %v1450_v25 = vpop.xlane.xlu1 %1449 }
 0xe2f   : > { %v1451_v26 = vmul.f32 0.03125, %v1450_v25 }
 0xe31   : > { %v1452_v27 = vadd.f32 1e-05, %v1451_v26 }
 0xe33   : > { %1912 = vrsqrt.f32 %v1452_v27 }
 0xe40   : > { %v1913_v28 = vpop.eup %1912 }
 0xe41   : > { %v1454_v31 = vmul.f32 %v1913_v28, %v1446_v23 }
 0xe43   : > { %v1459_v33 = vmul.f32 %v1634_v29, %v1454_v31 }
 0xe45   : > { %v1464_v34 = vadd.f32 %v1635_v32, %v1459_v33 }
 0xe47   : > { %1465 = vst.msk [vmem:[%s388_s24] sm:$0xff] %vm436_vm1, %v1464_v34 }
 0xe48   : > { %1979 = shalt.err (!%p1976_p9)
}
 0xe49   : > { %s1980_s17 = scalar_lea.hbm %s1479_s20, 128  ;;  %s1984_s5 = scalar_lea.hbm %s2480_s9, 256 }
 0xe4a   : > { %p1981_p12 = scmp.ne.s32.totalorder %s1479_s20, %s1980_s17  ;;  %p1985_p5 = scmp.lt.s32.totalorder %s1479_s20, %s2480_s9 }
 0xe4b   : > { %p1986_p3 = scmp.lt.s32.totalorder %s1984_s5, %s1980_s17 }
 0xe4c   : > { %p1982_p1 = pnand %p1981_p12, %p2493_p10 }
 0xe4d   : > { %p1987_p4 = por %p1986_p3, %p1985_p5 }
 0xe4e   : > { %p1983_p2 = pneg %p1982_p1 }
 0xe50   : > { %p1988_p8 = pnand %p1987_p4, %p1983_p2 }
 0xe52   : > { %1991 = shalt.err (!%p1988_p8)
}
 0xe53   : > { %1805 = dma.vmem_to_hbm [thread:$0]  (%p2493_p10), %s1482_s29, 128, %s1479_s20, %s1467_s25  }
 0xe54 PF: > { %p1822_p11 = scmp.ge.s32.totalorder %s2050_s14, 2  ;;  %s1493_s16 = sand.u32 1, %s2030_s30  }
 0xe55   : > { %p2494_p13 = scmp.ne.s32.totalorder %s2487_s21, 0  ;;  %s1494_s18 = scalar_lea.sflag [#allocation6], %s1493_s16 }
 0xe57   : > { %p1815_p0 = pnand %p1822_p11, %p2494_p13 }
 0xe59   : > { %p1816_p6 = pneg %p1815_p0 }
 0xe5b   : > { %2025 = dma.done.wait (%p1816_p6), %s1494_s18, 128  }
 0xe5c   : > { %2027 = vsyncadd (%p1816_p6), %s1494_s18, 4294967168  ;;  %s24_s14 = sadd.s32 1, %s2050_s14   ;;  %s2495_s19 = sld [smem:[#allocation13_spill]] }
 0xe5d   : > { %p21_p7 = scmp.ge.s32.totalorder %s24_s14, 4   ;;  %s2496_s30 = smov %s2034_s10 }
 0xe5e   : > { %s2497_s10 = smov %s2038_s11  ;;  %s2498_s11 = smov %s2167_s22 }
 0xe5f   : > { %s2499_s12 = smov %s2046_s13  ;;  %23 = sbr.rel (!%p21_p7) target bundleno = 9 (0x9), region = 107 }
 0xe62   : > { %s2500_s13 = smov %s2495_s19 }
 0xe64   :  { %1499 = vsyncpa [#allocation5], 1 }
 0xe65   :  { %1501 = vsyncpa [#allocation5 + $0x1], 1 }
 0xe66   :  { %1502 = vsyncpa [#allocation8], 1 }
 0xe67   :  { %1503 = vsyncpa [#allocation6], 1 }
 0xe68   :  { %1505 = vsyncpa [#allocation6 + $0x1], 1 }

// kernel: tpu_custom_call.1
= control target key start
LH: loop header
LB: loop body
LE: loop exit
PB: predicated region body
PF: predicated region fallthrough
CT: control target
= control target key end

     0   :  { %s2471_s0 = inlined_call_operand.vmem [shape: f32[2,8,32], index: 0, kind: input, shape index: {}]   ;;  %s2472_s1 = inlined_call_operand.vmem [shape: f32[2,8,32], index: 1, kind: input, shape index: {}]   ;;  %s2473_s2 = inlined_call_operand.vmem [shape: bf16[32,96], index: 2, kind: input, shape index: {}]   ;;  %s2474_s3 = inlined_call_operand.vmem [shape: f32[1,96], index: 3, kind: input, shape index: {}]   ;;  %s2475_s4 = inlined_call_operand.hbm [shape: bf16[32,32], index: 4, kind: input, shape index: {}]   ;;  %s2476_s5 = inlined_call_operand.hbm [shape: bf16[32,64], index: 5, kind: input, shape index: {}]   ;;  %s2477_s6 = inlined_call_operand.vmem [shape: f32[1,64], index: 6, kind: input, shape index: {}]   ;;  %s2478_s7 = inlined_call_operand.vmem [shape: bf16[64,32], index: 7, kind: input, shape index: {}]   ;;  %s2479_s8 = inlined_call_operand.vmem [shape: f32[6,32], index: 8, kind: input, shape index: {}]   ;;  %s2480_s9 = inlined_call_operand.hbm [shape: f32[2,8,32], index: 9, kind: output, shape index: {}]  }
   0x1   :  { %2483 = sst [smem:[#allocation14_spill]] %s2475_s4 }
   0x2   :  { %2484 = sst [smem:[#allocation15_spill]] %s2476_s5 }
   0x3   :  { %14 = vsyncpa [#allocation5], 0 }
   0x4   :  { %15 = vsyncpa [#allocation8], 0 }
   0x5   :  { %16 = vsyncpa [#allocation6], 0 }
   0x6   :  { %18 = vsyncpa [#allocation6 + $0x1], 0  ;;  %s2114_s30 = smov 0   ;;  %s2116_s10 = smov 0  }
   0x7   :  { %s2118_s11 = smov 0   ;;  %s2120_s12 = smov 0  }
   0x8   :  { %s2122_s13 = smov 0   ;;  %s2124_s14 = smov 0  }
   0x9 LB: > { %s1586_s15 = sadd.s32 4294967295, %s2050_s14   ;;  %s1587_s16 = sadd.s32 4294967294, %s2050_s14   ;;  %s2050_s14 = sphi %s2124_s14, %s24_s14   ;;  %s2046_s13 = sphi %s2122_s13, %s2500_s13   ;;  %s2042_s12 = sphi %s2120_s12, %s2499_s12   ;;  %s2038_s11 = sphi %s2118_s11, %s2498_s11   ;;  %s2034_s10 = sphi %s2116_s10, %s2497_s10   ;;  %s2030_s30 = sphi %s2114_s30, %s2496_s30  }
   0xa   : > { %s36_s17 = sadd.s32 1, %s2046_s13  ;;  %s246_s18 = sadd.s32 1, %s2038_s11 }
   0xb   : > { %p38_p0 = scmp.ge.s32.totalorder %s36_s17, 2  ;;  %p256_p1 = scmp.ne.s32.totalorder %s2038_s11, %s2034_s10 }
   0xc   : > { %p257_p2 = scmp.eq.s32.totalorder %s1586_s15, 1  ;;  %p262_p3 = scmp.ne.s32.totalorder %s2034_s10, %s2030_s30 }
   0xd   : > { %s2502_s17 = smov (%p38_p0, %s36_s17), 0  ;;  %p263_p5 = scmp.eq.s32.totalorder %s1587_s16, 1 }
   0xe   : > { %2485 = sst [smem:[#allocation13_spill]] %s2502_s17  ;;  %p2154_p4 = por %p257_p2, %p256_p1 }
   0xf   : > { %s241_s20 = ssub.s32 %s2046_s13, %s2502_s17  ;;  %p1588_p6 = scmp.ge.s32.totalorder %s2050_s14, 1 }
  0x10   : > { %s2486_s19 = scalar_select %p2154_p4, 1, 0 }
  0x11   : > { %p244_p7 = scmp.eq.s32.totalorder %s241_s20, 0  ;;  %p2161_p8 = por %p263_p5, %p262_p3 }
  0x12   : > { %p270_p9 = scmp.lt.s32.totalorder %s2050_s14, 3  ;;  %p2173_p11 = scmp.eq.s32.totalorder %s1586_s15, 0 }
  0x13   : > { %s2487_s21 = scalar_select %p2161_p8, 1, 0 }
  0x14   : > { %s2167_s22 = scalar_select %p244_p7, %s2038_s11, %s246_s18  }
  0x15   : > { %p2169_p10 = pnand %p1588_p6, %p270_p9  ;;  %s2052_s25 = smov [#allocation4]  }
  0x16   : > { %s288_s26 = sshll.u32 %s2052_s25, 4  ;;  %s2053_s28 = smov [#allocation7]   ;;  %s289_s26 = int_to_ptr.vmem [resolvable:$true] %s288_s26 }
  0x17   : > { %p1807_p12 = pneg %p2169_p10  ;;  %s301_s29 = sshll.u32 %s2053_s28, 4  ;;  %s302_s29 = int_to_ptr.vmem [resolvable:$true] %s301_s29 }
  0x18   : > { %s1925_s15 = scalar_lea.vmem %s289_s26, 256  ;;  %p1933_p5 = scmp.lt.s32.totalorder %s289_s26, %s289_s26 }
  0x19   : > { %p2181_p13 = pnand %p2173_p11, %p1807_p12  ;;  %p1926_p1 = scmp.ne.s32.totalorder %s289_s26, %s1925_s15 }
  0x1a   : > { %p1934_p6 = scmp.lt.s32.totalorder %s1925_s15, %s1925_s15 }
  0x1b   : > { %p1916_p0 = pneg %p2181_p13 }
  0x1c   : > { %p1935_p7 = por %p1934_p6, %p1933_p5 }
  0x1d   : > { %p1928_p2 = pnand %p1926_p1, %p1916_p0 }
  0x1f   : > { %p1929_p3 = pneg %p1928_p2 }
  0x21   : > { %p1936_p9 = pnand %p1935_p7, %p1929_p3 }
  0x23   : > { %1939 = shalt.err (!%p1936_p9)
}
  0x24   : > { %s2054_s16 = smov 64   ;;  %s2055_s18 = smov 4  }
  0x25   : > { %s2491_s4 = sld [smem:[#allocation14_spill]]  ;;  %s1951_s28 = scalar_lea.vmem %s302_s29, 256 }
  0x26   : > { %p1952_p12 = scmp.ne.s32.totalorder %s302_s29, %s1951_s28  ;;  %p1959_p8 = scmp.lt.s32.totalorder %s302_s29, %s302_s29 }
  0x27   : > { %p1960_p4 = scmp.lt.s32.totalorder %s1951_s28, %s1951_s28 }
  0x28   : > { %p1954_p1 = pnand %p1952_p12, %p1916_p0 }
  0x29   : > { %p1961_p5 = por %p1960_p4, %p1959_p8 }
  0x2a   : > { %p1955_p2 = pneg %p1954_p1 }
  0x2b   : > { %1810 = dma.hbm_to_vmem [thread:$0]  (!%p2181_p13), %s2491_s4, 256, %s289_s26, [#allocation5], %s2054_s16, %s2054_s16, %s2055_s18  }
  0x2c   : > { %p1962_p3 = pnand %p1961_p5, %p1955_p2 }
  0x2e   : > { %1965 = shalt.err (!%p1962_p3)
}
  0x2f   : > { %s2492_s5 = sld [smem:[#allocation15_spill]] }
  0x31   : > { %343 = sbr.rel (%p2169_p10) target bundleno = 3668 (0xe54), region = 56 }
  0x35   : > { %1813 = dma.hbm_to_vmem [thread:$0]  (!%p2181_p13), %s2492_s5, 256, %s302_s29, [#allocation8], %s2054_s16, %s2054_s16, %s2055_s18  }
  0x36   : > { %2017 = dma.done.wait (%p2173_p11), [#allocation5], 256  }
  0x37   : > { %2019 = vsyncadd (%p2173_p11), [#allocation5], 4294967040 }
  0x38   : > { %2021 = dma.done.wait (%p2173_p11), [#allocation8], 256  }
  0x39   : > { %2023 = vsyncadd (%p2173_p11), [#allocation8], 4294967040  ;;  %p389_p4 = scmp.lt.s32.totalorder %s2042_s12, 1  ;;  %v2056_v0 = vmov 0.0   ;;  %vm2057_vm0 = vmmov 0   ;;  %v1882_v1 = vld [vmem:[%s2473_s2 + $0x8] sm:$0xff]   ;;  %v604_v38 = vlaneseq }
  0x3a   : > { %1681 = vmatprep.subr.bf16.mxu1 %v2056_v0  ;;  %1685 = vmatprep.mubr.msk.bf16.mxu1 %vm2057_vm0, %v2056_v0  ;;  %s2058_s18 = smov 96   ;;  %v1883_v2 = vld [vmem:[%s2473_s2] sm:$0xff]   ;;  %v1884_v3 = vld [vmem:[%s2473_s2 + $0x8] sm:$0xff]   ;;  %s2059_s26 = smov 64   ;;  %vm436_vm1 = vcmask 261120   ;;  %vm530_vm2 = vcmask 257024  }
  0x3b   : > { %1697 = vmatprep.subr.bf16.mxu0 %v2056_v0  ;;  %1701 = vmatprep.mubr.msk.bf16.mxu0 %vm2057_vm0, %v2056_v0  ;;  %s390_s17 = scalar_select %p389_p4, %s2042_s12, 1  ;;  %v1885_v4 = vld [vmem:[%s2473_s2] sm:$0xff]   ;;  %vm619_vm3 = vcmask 64512   ;;  %v2287_v39 = vshrl.u32 %v604_v38, 7  ;;  %v2289_v40 = vand.u32 127, %v604_v38  ;;  %vm682_vm5 = vcmask 1043456  }
  0x3c   : > { %429 = vrot.lane.b32.xlu0 %v1882_v1, %s2058_s18  ;;  %v2241_v6 = vld [vmem:[%s2474_s3] ss:$0 sm:$0xff]  ;;  %1698 = vmatpush3.bf16.msra.mxu0 %v1884_v3  ;;  %s2061_s29 = smov 112   ;;  %vm1395_vm6 = vcmask 523264   ;;  %s386_s15 = sand.u32 1, %s2034_s10  }
  0x3d   : > { %s1596_s24 = sshll.u32 %s390_s17, 3  ;;  %433 = vrot.lane.b32.xlu1 %v2241_v6, %s2058_s18  ;;  %1699 = vmatprep.subr.bf16.mxu0 %v2056_v0  ;;  %vm610_vm4 = vcmp.le.s32.totalorder %v2289_v40, %v2287_v39  ;;  %s1595_s17 = sshll.u32 %s386_s15, 3 }
  0x3e   : > { %s395_s16 = scalar_lea.vmem %s2471_s0, %s1596_s24  ;;  %s399_s27 = scalar_lea.vmem %s2472_s1, %s1596_s24 }
  0x3f   : > { %v2236_v5 = vld [vmem:[%s395_s16] sm:$0xff]  ;;  %s2060_s24 = smov 120   ;;  %s2062_s16 = smov 104  }
  0x40   : > { %427 = vrot.lane.b32.xlu0 %v1883_v2, %s2058_s18  ;;  %v535_v7 = vpack.c.bf16 %v2236_v5, %v2236_v5  ;;  %1700 = vmatpush3.bf16.msra.mxu0 %v1885_v4  ;;  %v405_v9 = vld [vmem:[%s399_s27] sm:$0xff]  ;;  %s1637_s27 = sshll.u32 %s2042_s12, 7  ;;  %s1467_s25 = scalar_lea.sflag [#allocation6], %s386_s15 }
  0x41   : > { %482 = vrot.lane.b32.xlu1 %v1882_v1, %s2059_s26  ;;  %1711 = vmatprep.subr.bf16.mxu0 %v2056_v0  ;;  %v406_v11 = vpack.c.bf16 %v405_v9, %v405_v9  ;;  %s1479_s20 = scalar_lea.hbm %s2480_s9, %s1637_s27  ;;  %p2493_p10 = scmp.ne.s32.totalorder %s2486_s19, 0 }
  0x42   : > { %s2063_s23 = smov [#allocation9]  }
  0x43   : > { %1702 = vmatmul.mubr.msk.bf16.vlgmr.msra.gmra.mxu0 %vm436_vm1, %v535_v7 }
  0x44   : > { %480 = vrot.lane.b32.xlu0 %v1883_v2, %s2059_s26  ;;  %1713 = vmatprep.mubr.msk.bf16.mxu0 %vm2057_vm0, %v2056_v0 }
  0xae   : > { %v430_v8 = vpop.permute.xlu0 %429 }
  0xaf   : > { %1682 = vmatpush3.bf16.msra.mxu1 %v430_v8  ;;  %v434_v12 = vpop.permute.xlu1 %433 }
  0xb0   : > { %1683 = vmatprep.subr.bf16.mxu1 %v2056_v0 }
  0xb2   : > { %v428_v10 = vpop.permute.xlu0 %427 }
  0xb3   : > { %1684 = vmatpush3.bf16.msra.mxu1 %v428_v10  ;;  %v483_v13 = vpop.permute.xlu1 %482 }
  0xb4   : > { %1689 = vmatprep.subr.bf16.mxu1 %v2056_v0 }
  0xb6   : > { %1686 = vmatmul.mubr.msk.bf16.vlgmr.msra.gmra.mxu1 %vm436_vm1, %v406_v11  ;;  %v481_v14 = vpop.permute.xlu0 %480 }
  0xb7   : > { %1693 = vmatprep.mubr.msk.bf16.mxu1 %vm2057_vm0, %v2056_v0  ;;  %1690 = vmatpush3.bf16.msra.mxu1 %v483_v13 }
  0xb8   : > { %1691 = vmatprep.subr.bf16.mxu1 %v2056_v0 }
  0xbb   : > { %1692 = vmatpush3.bf16.msra.mxu1 %v481_v14 }
  0xbc   : > { %1705 = vmatprep.subr.bf16.mxu1 %v2056_v0 }
  0xbe   : > { %1694 = vmatmul.mubr.msk.bf16.vlgmr.msra.gmra.mxu1 %vm436_vm1, %v406_v11  ;;  %v614_v11 = vld [vmem:[#allocation4 + $0x4] sm:$0xf] }
  0xbf   : > { %1707 = vmatprep.mubr.msk.bf16.mxu1 %vm2057_vm0, %v2056_v0 }
 0x103   : > { %v597_v15 = vpop.f32.mrf.mxu0 }
 0x104   : > { %v598_v16 = vadd.f32 %v2241_v6, %v597_v15 }
 0x105   : > { %v1703_v17 = vpop.f32.mrf.mxu0 }
 0x106   : > { %v617_v18 = vmul.f32 0.35355338, %v598_v16  ;;  %v613_v17 = vld [vmem:[#allocation4] sm:$0xf] }
 0x107   : > { %v600_v19 = vpop.f32.mrf.mxu0 }
 0x108   : > { %v2267_v20 = vpack.c.bf16 %v617_v18, %v617_v18 }
 0x109   : > { %v1704_v21 = vpop.f32.mrf.mxu0 }
 0x10a   : > { %728 = vrot.lane.b32.xlu0 %v2267_v20, %s2060_s24  ;;  %v896_v21 = vsel %vm682_vm5, %v613_v17, 0 }
 0x176   : > { %v474_v22 = vpop.f32.mrf.mxu1 }
 0x177   : > { %v475_v23 = vadd.f32 %v474_v22, %v434_v12  ;;  %v850_v12 = vsel %vm682_vm5, %v614_v11, 0 }
 0x178   : > { %v1687_v24 = vpop.f32.mrf.mxu1 }
 0x179   : > { %v529_v25 = vpack.c.bf16 %v475_v23, %v475_v23 }
 0x17a   : > { %v477_v26 = vpop.f32.mrf.mxu1 }
 0x17b   : > { %531 = vst.msk [vmem:[#allocation2] sm:$0xf] %vm530_vm2, %v529_v25 }
 0x17c   : > { %v1688_v27 = vpop.f32.mrf.mxu1  ;;  %v729_v37 = vpop.permute.xlu0 %728 }
 0x17e   : > { %v523_v31 = vpop.f32.mrf.mxu1 }
 0x180   : > { %v1695_v32 = vpop.f32.mrf.mxu1 }
 0x182   : > { %v611_v28 = vld [vmem:[#allocation2] sm:$0xf]  ;;  %v526_v33 = vpop.f32.mrf.mxu1 }
 0x183   : > { %v624_v29 = vsel %vm619_vm3, %v611_v28, 0  ;;  %v2273_v30 = vcombine.low %v611_v28, %v611_v28 }
 0x184   : > { %1706 = vmatpush3.bf16.xpose.msra.mxu1 %v624_v29  ;;  %v1696_v34 = vpop.f32.mrf.mxu1 }
 0x185   : > { %733 = vrot.lane.b32.xlu1 %v2273_v30, %s2060_s24  ;;  %1717 = vmatprep.subr.bf16.mxu1 %v2056_v0 }
 0x18b   : > { %1708 = vmatmul.mubr.msk.bf16.vlgmr.msra.gmra.mxu1 %vm619_vm3, %v2267_v20 }
 0x18c   : > { %1719 = vmatprep.mubr.msk.bf16.mxu1 %vm2057_vm0, %v2056_v0 }
 0x1f7   : > { %v734_v35 = vpop.permute.xlu1 %733 }
 0x1f8   : > { %v739_v36 = vsel %vm619_vm3, %v734_v35, 0 }
 0x1f9   : > { %1718 = vmatpush3.bf16.xpose.msra.mxu1 %v739_v36 }
 0x1fa   : > { %1729 = vmatprep.subr.bf16.mxu1 %v2056_v0 }
 0x200   : > { %1720 = vmatmul.mubr.msk.bf16.vlgmr.msra.gmra.mxu1 %vm619_vm3, %v729_v37 }
 0x201   : > { %1731 = vmatprep.mubr.msk.bf16.mxu1 %vm2057_vm0, %v2056_v0  ;;  %1730 = vmatpush3.bf16.msra.mxu1 %v850_v12 }
 0x202   : > { %1741 = vmatprep.subr.bf16.mxu1 %v2056_v0 }
 0x24b   : > { %v660_v41 = vpop.f32.mrf.mxu1 }
 0x24c   : > { %v666_v42 = vsel %vm610_vm4, %v660_v41, -1e+30 }
 0x24d   : > { %v1709_v43 = vpop.f32.mrf.mxu1  ;;  %v667_v44 = vsel %vm619_vm3, %v666_v42, -inf }
 0x24e   : > { %668 = vmax.xlane.f32.xlu1 %v667_v44 }
 0x24f   : > { %v663_v45 = vpop.f32.mrf.mxu1 }
 0x251   : > { %v1710_v46 = vpop.f32.mrf.mxu1 }
 0x2c0   : > { %v775_v47 = vpop.f32.mrf.mxu1 }
 0x2c1   : > { %v781_v48 = vsel %vm610_vm4, %v775_v47, -1e+30 }
 0x2c2   : > { %v1721_v49 = vpop.f32.mrf.mxu1  ;;  %v782_v50 = vsel %vm619_vm3, %v781_v48, -inf }
 0x2c3   : > { %783 = vmax.xlane.f32.xlu0 %v782_v50 }
 0x2c4   : > { %v778_v51 = vpop.f32.mrf.mxu1 }
 0x2c6   : > { %v1722_v52 = vpop.f32.mrf.mxu1 }
 0x2d7   : > { %v669_v53 = vpop.xlane.xlu1 %668 }
 0x2d8   : > { %v670_v54 = vsub.f32 %v666_v42, %v669_v53 }
 0x2d9   : > { %486 = vrot.lane.b32.xlu0 %v2241_v6, %s2059_s26  ;;  %s1970_s26 = sshll.u32 %s2063_s23, 4  ;;  %s1971_s26 = int_to_ptr.vmem [resolvable:$false] %s1970_s26 }
 0x2da   : > { %v671_v55 = vmul.f32 1.442695, %v670_v54  ;;  %s1972_s12 = scalar_lea.vmem %s1971_s26, 256 }
 0x2dc   : > { %1894 = vpow2.f32 %v671_v55 }
 0x2dd   : > { %940 = vrot.lane.b32.xlu0 %v2273_v30, %s2061_s29 }
 0x2e1   : > { %938 = vrot.lane.b32.xlu0 %v2267_v20, %s2061_s29 }
 0x2e9   : > { %v1895_v56 = vpop.eup %1894 }
 0x2ea   : > { %v673_v57 = vsel %vm619_vm3, %v1895_v56, 0.0 }
 0x2eb   : > { %674 = vadd.xlane.f32.xlu1 %v673_v57 }
 0x34c   : > { %v784_v58 = vpop.xlane.xlu0 %783 }
 0x34d   : > { %v785_v59 = vsub.f32 %v781_v48, %v784_v58 }
 0x34f   : > { %v786_v60 = vmul.f32 1.442695, %v785_v59 }
 0x350   : > { %v487_v61 = vpop.permute.xlu0 %486 }
 0x351   : > { %1896 = vpow2.f32 %v786_v60  ;;  %v524_v62 = vadd.f32 %v523_v31, %v487_v61 }
 0x353   : > { %v532_v63 = vpack.c.bf16 %v524_v62, %v524_v62 }
 0x354   : > { %v941_v27 = vpop.permute.xlu0 %940 }
 0x355   : > { %533 = vst.msk [vmem:[#allocation3] sm:$0xf] %vm530_vm2, %v532_v63  ;;  %v946_v32 = vsel %vm619_vm3, %v941_v27, 0 }
 0x358   : > { %v939_v35 = vpop.permute.xlu0 %938 }
 0x35c   : > { %v612_v1 = vld [vmem:[#allocation3] sm:$0xf] }
 0x35d   : > { %v684_v2 = vsel %vm682_vm5, %v612_v1, 0  ;;  %v2312_v6 = vcombine.low %v612_v1, %v612_v1  ;;  %v615_v1 = vld [vmem:[#allocation4 + $0x8] sm:$0xf] }
 0x35e   : > { %v1897_v3 = vpop.eup %1896  ;;  %1712 = vmatpush3.bf16.msra.mxu0 %v684_v2  ;;  %v1054_v2 = vsel %vm682_vm5, %v615_v1, 0 }
 0x35f   : > { %v788_v4 = vsel %vm619_vm3, %v1897_v3, 0.0  ;;  %1723 = vmatprep.subr.bf16.mxu0 %v2056_v0 }
 0x360   : > { %789 = vadd.xlane.f32.xlu1 %v788_v4 }
 0x371   : > { %797 = vrot.lane.b32.xlu1 %v2312_v6, %s2060_s24  ;;  %s388_s24 = scalar_lea.vmem [#allocation9], %s1595_s17 }
 0x374   : > { %v675_v7 = vpop.xlane.xlu1 %674 }
 0x375   : > { %1898 = vrcp.f32 %v675_v7 }
 0x382   : > { %v1899_v8 = vpop.eup %1898 }
 0x383   : > { %v677_v9 = vmul.f32 %v1899_v8, %v1895_v56 }
 0x385   : > { %v678_v10 = vpack.c.bf16 %v677_v9, %v677_v9 }
 0x387   : > { %1714 = vmatmul.mubr.msk.bf16.vlgmr.msra.gmra.mxu0 %vm619_vm3, %v678_v10 }
 0x388   : > { %1725 = vmatprep.mubr.msk.bf16.mxu0 %vm2057_vm0, %v2056_v0 }
 0x3e9   : > { %v790_v13 = vpop.xlane.xlu1 %789 }
 0x3ea   : > { %1900 = vrcp.f32 %v790_v13 }
 0x3ed   : > { %v798_v14 = vpop.permute.xlu1 %797 }
 0x3ee   : > { %v803_v15 = vsel %vm682_vm5, %v798_v14, 0 }
 0x3ef   : > { %1724 = vmatpush3.bf16.msra.mxu0 %v803_v15 }
 0x3f0   : > { %1735 = vmatprep.subr.bf16.mxu0 %v2056_v0 }
 0x3f7   : > { %v1901_v16 = vpop.eup %1900 }
 0x3f8   : > { %v792_v18 = vmul.f32 %v1901_v16, %v1897_v3 }
 0x3fa   : > { %v793_v19 = vpack.c.bf16 %v792_v18, %v792_v18 }
 0x3fc   : > { %1726 = vmatmul.mubr.msk.bf16.vlgmr.msra.gmra.mxu0 %vm619_vm3, %v793_v19 }
 0x3fd   : > { %1736 = vmatpush3.bf16.msra.mxu0 %v896_v21  ;;  %1737 = vmatprep.mubr.msk.bf16.mxu0 %vm2057_vm0, %v2056_v0 }
 0x3fe   : > { %1747 = vmatprep.subr.bf16.mxu0 %v2056_v0 }
 0x447   : > { %v720_v22 = vpop.f32.mrf.mxu0 }
 0x448   : > { %v726_v23 = vpack.c.bf16 %v720_v22, %v720_v22 }
 0x449   : > { %v1715_v24 = vpop.f32.mrf.mxu0 }
 0x44a   : > { %1738 = vmatmul.mubr.msk.bf16.vlgmr.msra.gmra.mxu0 %vm619_vm3, %v726_v23 }
 0x44b   : > { %v723_v25 = vpop.f32.mrf.mxu0  ;;  %1749 = vmatprep.mubr.msk.bf16.mxu0 %vm2057_vm0, %v2056_v0 }
 0x44d   : > { %v1716_v26 = vpop.f32.mrf.mxu0 }
 0x4bc   : > { %v839_v28 = vpop.f32.mrf.mxu0 }
 0x4bd   : > { %v845_v29 = vpack.c.bf16 %v839_v28, %v839_v28 }
 0x4be   : > { %v1727_v31 = vpop.f32.mrf.mxu0 }
 0x4bf   : > { %1732 = vmatmul.mubr.msk.bf16.vlgmr.msra.gmra.mxu1 %vm619_vm3, %v845_v29 }
 0x4c0   : > { %1742 = vmatpush3.bf16.xpose.msra.mxu1 %v946_v32  ;;  %v842_v33 = vpop.f32.mrf.mxu0  ;;  %1743 = vmatprep.mubr.msk.bf16.mxu1 %vm2057_vm0, %v2056_v0 }
 0x4c1   : > { %1753 = vmatprep.subr.bf16.mxu1 %v2056_v0 }
 0x4c2   : > { %v1728_v34 = vpop.f32.mrf.mxu0 }
 0x4c7   : > { %1744 = vmatmul.mubr.msk.bf16.vlgmr.msra.gmra.mxu1 %vm619_vm3, %v939_v35 }
 0x4c8   : > { %1755 = vmatprep.mubr.msk.bf16.mxu1 %vm2057_vm0, %v2056_v0  ;;  %1754 = vmatpush3.bf16.msra.mxu1 %v1054_v2 }
 0x4c9   : > { %1765 = vmatprep.subr.bf16.mxu1 %v2056_v0 }
 0x50a   : > { %v2339_v36 = vpop.f32.mrf.mxu0 }
 0x50c   : > { %v1739_v37 = vpop.f32.mrf.mxu0 }
 0x50e   : > { %v935_v38 = vpop.f32.mrf.mxu0 }
 0x510   : > { %v1740_v41 = vpop.f32.mrf.mxu0 }
 0x57f   : > { %v2341_v42 = vpop.f32.mrf.mxu1 }
 0x580   : > { %v933_v22 = vadd.f32 %v2339_v36, %v2341_v42  ;;  %v1621_v42 = vld [vmem:[%s2479_s8] ss:$0 sm:$0xff] }
 0x581   : > { %v1733_v43 = vpop.f32.mrf.mxu1 }
 0x583   : > { %v889_v44 = vpop.f32.mrf.mxu1 }
 0x585   : > { %v1734_v45 = vpop.f32.mrf.mxu1 }
 0x587   : > { %v982_v46 = vpop.f32.mrf.mxu1 }
 0x588   : > { %v988_v47 = vsel %vm610_vm4, %v982_v46, -1e+30 }
 0x589   : > { %v1745_v48 = vpop.f32.mrf.mxu1  ;;  %v989_v49 = vsel %vm619_vm3, %v988_v47, -inf }
 0x58a   : > { %990 = vmax.xlane.f32.xlu1 %v989_v49 }
 0x58b   : > { %v985_v50 = vpop.f32.mrf.mxu1 }
 0x58d   : > { %v1746_v51 = vpop.f32.mrf.mxu1 }
 0x59b   : > { %1099 = vrot.lane.b32.xlu1 %v2273_v30, %s2062_s16 }
 0x59f   : > { %1097 = vrot.lane.b32.xlu1 %v2267_v20, %s2062_s16 }
 0x613   : > { %v991_v52 = vpop.xlane.xlu1 %990 }
 0x614   : > { %v992_v53 = vsub.f32 %v988_v47, %v991_v52 }
 0x616   : > { %v993_v54 = vmul.f32 1.442695, %v992_v53 }
 0x617   : > { %v1100_v60 = vpop.permute.xlu1 %1099 }
 0x618   : > { %1902 = vpow2.f32 %v993_v54  ;;  %v1105_v62 = vsel %vm619_vm3, %v1100_v60, 0  ;;  %v1622_v60 = vld [vmem:[%s2479_s8 + $0x2] ss:$0 sm:$0xff] }
 0x61b   : > { %v1098_v63 = vpop.permute.xlu1 %1097 }
 0x625   : > { %v1903_v55 = vpop.eup %1902 }
 0x626   : > { %v995_v56 = vsel %vm619_vm3, %v1903_v55, 0.0 }
 0x627   : > { %996 = vadd.xlane.f32.xlu0 %v995_v56  ;;  %v1889_v56 = vld [vmem:[#allocation7] sm:$0xff]  }
 0x63d   : > { %1001 = vrot.lane.b32.xlu0 %v2312_v6, %s2061_s29  ;;  %s1481_s29 = sshll.u32 %s388_s24, 4  ;;  %s1482_s29 = int_to_ptr.vmem [resolvable:$true] %s1481_s29 }
 0x63e   : > { %s1966_s28 = scalar_lea.vmem %s1482_s29, 128  ;;  %p1973_p0 = scmp.lt.s32.totalorder %s1482_s29, %s1971_s26 }
 0x63f   : > { %p1967_p8 = scmp.ne.s32.totalorder %s1482_s29, %s1966_s28  ;;  %p1974_p6 = scmp.lt.s32.totalorder %s1972_s12, %s1966_s28 }
 0x641   : > { %p1968_p11 = pnand %p1967_p8, %p2493_p10  ;;  %p1975_p7 = por %p1974_p6, %p1973_p0 }
 0x643   : > { %p1969_p13 = pneg %p1968_p11 }
 0x645   : > { %p1976_p9 = pnand %p1975_p7, %p1969_p13 }
 0x6b0   : > { %v997_v57 = vpop.xlane.xlu0 %996 }
 0x6b1   : > { %1904 = vrcp.f32 %v997_v57  ;;  %v1891_v57 = vld [vmem:[%s2478_s7 + $0x10] sm:$0xff]  }
 0x6b4   : > { %v1002_v58 = vpop.permute.xlu0 %1001 }
 0x6b5   : > { %v1007_v59 = vsel %vm682_vm5, %v1002_v58, 0 }
 0x6b6   : > { %1748 = vmatpush3.bf16.msra.mxu0 %v1007_v59 }
 0x6b7   : > { %1759 = vmatprep.subr.bf16.mxu0 %v2056_v0 }
 0x6be   : > { %v1905_v20 = vpop.eup %1904 }
 0x6bf   : > { %v999_v30 = vmul.f32 %v1905_v20, %v1903_v55  ;;  %v1888_v55 = vld [vmem:[#allocation7 + $0x8] sm:$0xff]  }
 0x6c1   : > { %v1000_v61 = vpack.c.bf16 %v999_v30, %v999_v30 }
 0x6c3   : > { %1750 = vmatmul.mubr.msk.bf16.vlgmr.msra.gmra.mxu0 %vm619_vm3, %v1000_v61 }
 0x6c4   : > { %1760 = vmatpush3.bf16.xpose.msra.mxu0 %v1105_v62  ;;  %1761 = vmatprep.mubr.msk.bf16.mxu0 %vm2057_vm0, %v2056_v0  ;;  %v1623_v62 = vld [vmem:[%s2479_s8 + $0x3] ss:$0 sm:$0xff] }
 0x6c5   : > { %1771 = vmatprep.subr.bf16.mxu0 %v2056_v0 }
 0x6cb   : > { %1762 = vmatmul.mubr.msk.bf16.vlgmr.msra.gmra.mxu0 %vm619_vm3, %v1098_v63 }
 0x6cc   : > { %1773 = vmatprep.mubr.msk.bf16.mxu0 %vm2057_vm0, %v2056_v0 }
 0x783   : > { %v1043_v3 = vpop.f32.mrf.mxu0 }
 0x784   : > { %v1049_v4 = vpack.c.bf16 %v1043_v3, %v1043_v3  ;;  %v1892_v3 = vld [vmem:[%s2478_s7 + $0x8] sm:$0xff]  }
 0x785   : > { %v1751_v7 = vpop.f32.mrf.mxu0 }
 0x786   : > { %1756 = vmatmul.mubr.msk.bf16.vlgmr.msra.gmra.mxu1 %vm619_vm3, %v1049_v4  ;;  %v1893_v4 = vld [vmem:[%s2478_s7] sm:$0xff]  }
 0x787   : > { %v1046_v8 = vpop.f32.mrf.mxu0  ;;  %1767 = vmatprep.mubr.msk.bf16.mxu1 %vm2057_vm0, %v2056_v0  ;;  %v1624_v7 = vld [vmem:[%s2477_s6] ss:$0 sm:$0xff] }
 0x789   : > { %v1752_v9 = vpop.f32.mrf.mxu0 }
 0x78b   : > { %v1141_v10 = vpop.f32.mrf.mxu0 }
 0x78c   : > { %v1147_v11 = vsel %vm610_vm4, %v1141_v10, -1e+30 }
 0x78d   : > { %v1763_v12 = vpop.f32.mrf.mxu0  ;;  %v1148_v13 = vsel %vm619_vm3, %v1147_v11, -inf }
 0x78e   : > { %1149 = vmax.xlane.f32.xlu0 %v1148_v13 }
 0x78f   : > { %v1144_v14 = vpop.f32.mrf.mxu0 }
 0x791   : > { %v1764_v15 = vpop.f32.mrf.mxu0 }
 0x7a4   : > { %1160 = vrot.lane.b32.xlu0 %v2312_v6, %s2062_s16  ;;  %v616_v6 = vld [vmem:[#allocation4 + $0xc] sm:$0xf] }
 0x7a5   : > { %v1213_v26 = vsel %vm682_vm5, %v616_v6, 0 }
 0x7a6   : > { %1772 = vmatpush3.bf16.msra.mxu0 %v1213_v26 }
 0x7a7   : > { %1785 = vmatprep.subr.bf16.mxu0 %v2056_v0 }
 0x817   : > { %v1150_v16 = vpop.xlane.xlu0 %1149 }
 0x818   : > { %v1151_v17 = vsub.f32 %v1147_v11, %v1150_v16 }
 0x81a   : > { %v1152_v18 = vmul.f32 1.442695, %v1151_v17 }
 0x81b   : > { %v1161_v19 = vpop.permute.xlu0 %1160 }
 0x81c   : > { %1906 = vpow2.f32 %v1152_v18  ;;  %v1166_v21 = vsel %vm682_vm5, %v1161_v19, 0 }
 0x81d   : > { %1766 = vmatpush3.bf16.msra.mxu1 %v1166_v21 }
 0x81e   : > { %1777 = vmatprep.subr.bf16.mxu1 %v2056_v0 }
 0x829   : > { %v1907_v39 = vpop.eup %1906 }
 0x82a   : > { %v1154_v40 = vsel %vm619_vm3, %v1907_v39, 0.0 }
 0x82b   : > { %1155 = vadd.xlane.f32.xlu1 %v1154_v40 }
 0x846   : > { %v1090_v23 = vpop.f32.mrf.mxu1 }
 0x847   : > { %v1096_v24 = vadd.f32 %v1090_v23, %v933_v22 }
 0x848   : > { %v1757_v25 = vpop.f32.mrf.mxu1 }
 0x84a   : > { %v1093_v27 = vpop.f32.mrf.mxu1 }
 0x84c   : > { %v1758_v28 = vpop.f32.mrf.mxu1 }
 0x8b4   : > { %v1156_v29 = vpop.xlane.xlu1 %1155 }
 0x8b5   : > { %1908 = vrcp.f32 %v1156_v29  ;;  %v1634_v29 = vld [vmem:[%s2479_s8 + $0x4] ss:$0 sm:$0xff] }
 0x8c2   : > { %v1909_v31 = vpop.eup %1908 }
 0x8c3   : > { %v1158_v32 = vmul.f32 %v1909_v31, %v1907_v39 }
 0x8c5   : > { %v1159_v33 = vpack.c.bf16 %v1158_v32, %v1158_v32  ;;  %v1635_v32 = vld [vmem:[%s2479_s8 + $0x5] ss:$0 sm:$0xff] }
 0x8c7   : > { %1768 = vmatmul.mubr.msk.bf16.vlgmr.msra.gmra.mxu1 %vm619_vm3, %v1159_v33 }
 0x8c8   : > { %1781 = vmatprep.mubr.msk.bf16.mxu1 %vm2057_vm0, %v2056_v0  ;;  %1778 = vmatpush3.bf16.msra.mxu1 %v1888_v55 }
 0x8c9   : > { %1779 = vmatprep.subr.bf16.mxu1 %v2056_v0 }
 0x8cc   : > { %1780 = vmatpush3.bf16.msra.mxu1 %v1889_v56 }
 0x987   : > { %v1202_v34 = vpop.f32.mrf.mxu1 }
 0x988   : > { %v1208_v35 = vpack.c.bf16 %v1202_v34, %v1202_v34 }
 0x989   : > { %v1769_v36 = vpop.f32.mrf.mxu1 }
 0x98a   : > { %1774 = vmatmul.mubr.msk.bf16.vlgmr.msra.gmra.mxu0 %vm619_vm3, %v1208_v35 }
 0x98b   : > { %v1205_v37 = vpop.f32.mrf.mxu1  ;;  %1793 = vmatprep.mubr.msk.bf16.mxu0 %vm2057_vm0, %v2056_v0 }
 0x98d   : > { %v1770_v38 = vpop.f32.mrf.mxu1 }
 0xa4a   : > { %v1249_v41 = vpop.f32.mrf.mxu0 }
 0xa4b   : > { %v1255_v43 = vadd.f32 %v1249_v41, %v1096_v24 }
 0xa4c   : > { %v1775_v44 = vpop.f32.mrf.mxu0 }
 0xa4d   : > { %v1261_v45 = vadd.f32 %v1621_v42, %v1255_v43 }
 0xa4e   : > { %v1252_v46 = vpop.f32.mrf.mxu0 }
 0xa4f   : > { %v1262_v47 = vadd.f32 %v1261_v45, %v2236_v5  ;;  %v1890_v5 = vld [vmem:[%s2478_s7 + $0x18] sm:$0xff]  }
 0xa50   : > { %v1776_v48 = vpop.f32.mrf.mxu0  ;;  %1786 = vmatpush3.bf16.msra.mxu0 %v1890_v5 }
 0xa51   : > { %v1265_v49 = vsel %vm436_vm1, %v1262_v47, 0.0  ;;  %1787 = vmatprep.subr.bf16.mxu0 %v2056_v0 }
 0xa52   : > { %1266 = vadd.xlane.f32.xlu1 %v1265_v49 }
 0xa54   : > { %1788 = vmatpush3.bf16.msra.mxu0 %v1891_v57 }
 0xa55   : > { %1789 = vmatprep.subr.bf16.mxu0 %v2056_v0 }
 0xa58   : > { %1790 = vmatpush3.bf16.msra.mxu0 %v1892_v3 }
 0xa59   : > { %1791 = vmatprep.subr.bf16.mxu0 %v2056_v0  ;;  %v1628_v0 = vld [vmem:[%s2479_s8 + $0x1] ss:$0 sm:$0xff] }
 0xa5c   : > { %1792 = vmatpush3.bf16.msra.mxu0 %v1893_v4 }
 0xadb   : > { %v1267_v50 = vpop.xlane.xlu1 %1266 }
 0xadc   : > { %v1269_v51 = vmul.f32 0.03125, %v1267_v50 }
 0xade   : > { %v1270_v52 = vsub.f32 %v1262_v47, %v1269_v51 }
 0xae0   : > { %v1271_v53 = vmul.f32 %v1270_v52, %v1270_v52 }
 0xae2   : > { %v1272_v54 = vsel %vm436_vm1, %v1271_v53, 0.0 }
 0xae3   : > { %1273 = vadd.xlane.f32.xlu1 %v1272_v54 }
 0xb6c   : > { %v1274_v58 = vpop.xlane.xlu1 %1273 }
 0xb6d   : > { %v1275_v59 = vmul.f32 0.03125, %v1274_v58 }
 0xb6f   : > { %v1276_v20 = vadd.f32 1e-05, %v1275_v59 }
 0xb71   : > { %1910 = vrsqrt.f32 %v1276_v20 }
 0xb7e   : > { %v1911_v30 = vpop.eup %1910 }
 0xb7f   : > { %v1278_v61 = vmul.f32 %v1911_v30, %v1270_v52 }
 0xb81   : > { %v1283_v63 = vmul.f32 %v1622_v60, %v1278_v61 }
 0xb83   : > { %v1288_v1 = vadd.f32 %v1623_v62, %v1283_v63 }
 0xb85   : > { %v1289_v2 = vpack.c.bf16 %v1288_v1, %v1288_v1 }
 0xb87   : > { %1782 = vmatmul.mubr.msk.bf16.vlgmr.msra.gmra.mxu1 %vm436_vm1, %v1289_v2 }
 0xc47   : > { %v1350_v8 = vpop.f32.mrf.mxu1 }
 0xc48   : > { %v1351_v9 = vadd.f32 %v1624_v7, %v1350_v8 }
 0xc49   : > { %v1783_v10 = vpop.f32.mrf.mxu1 }
 0xc4a   : > { %v1356_v11 = vmax.f32 %v1351_v9, 0.0 }
 0xc4b   : > { %v1353_v12 = vpop.f32.mrf.mxu1 }
 0xc4c   : > { %v1357_v13 = vpack.c.bf16 %v1356_v11, %v1356_v11 }
 0xc4d   : > { %v1784_v14 = vpop.f32.mrf.mxu1 }
 0xc4e   : > { %1794 = vmatmul.mubr.msk.bf16.vlgmr.msra.gmra.mxu0 %vm1395_vm6, %v1357_v13 }
 0xd0e   : > { %v1433_v15 = vpop.f32.mrf.mxu0 }
 0xd0f   : > { %v1434_v16 = vadd.f32 %v1628_v0, %v1433_v15 }
 0xd10   : > { %v1795_v17 = vpop.f32.mrf.mxu0 }
 0xd11   : > { %v1439_v18 = vadd.f32 %v1434_v16, %v1288_v1 }
 0xd12   : > { %v1436_v19 = vpop.f32.mrf.mxu0 }
 0xd13   : > { %v1442_v21 = vsel %vm436_vm1, %v1439_v18, 0.0 }
 0xd14   : > { %1443 = vadd.xlane.f32.xlu1 %v1442_v21  ;;  %v1796_v39 = vpop.f32.mrf.mxu0 }
 0xd9d   : > { %v1444_v40 = vpop.xlane.xlu1 %1443 }
 0xd9e   : > { %v1445_v22 = vmul.f32 0.03125, %v1444_v40 }
 0xda0   : > { %v1446_v23 = vsub.f32 %v1439_v18, %v1445_v22 }
 0xda2   : > { %v1447_v24 = vmul.f32 %v1446_v23, %v1446_v23 }
 0xda4   : > { %v1448_v6 = vsel %vm436_vm1, %v1447_v24, 0.0 }
 0xda5   : > { %1449 = vadd.xlane.f32.xlu1 %v1448_v6 }
 0xe2e   : > { %v1450_v25 = vpop.xlane.xlu1 %1449 }
 0xe2f   : > { %v1451_v26 = vmul.f32 0.03125, %v1450_v25 }
 0xe31   : > { %v1452_v27 = vadd.f32 1e-05, %v1451_v26 }
 0xe33   : > { %1912 = vrsqrt.f32 %v1452_v27 }
 0xe40   : > { %v1913_v28 = vpop.eup %1912 }
 0xe41   : > { %v1454_v31 = vmul.f32 %v1913_v28, %v1446_v23 }
 0xe43   : > { %v1459_v33 = vmul.f32 %v1634_v29, %v1454_v31 }
 0xe45   : > { %v1464_v34 = vadd.f32 %v1635_v32, %v1459_v33 }
 0xe47   : > { %1465 = vst.msk [vmem:[%s388_s24] sm:$0xff] %vm436_vm1, %v1464_v34 }
 0xe48   : > { %1979 = shalt.err (!%p1976_p9)
}
 0xe49   : > { %s1980_s17 = scalar_lea.hbm %s1479_s20, 128  ;;  %s1984_s5 = scalar_lea.hbm %s2480_s9, 256 }
 0xe4a   : > { %p1981_p12 = scmp.ne.s32.totalorder %s1479_s20, %s1980_s17  ;;  %p1985_p5 = scmp.lt.s32.totalorder %s1479_s20, %s2480_s9 }
 0xe4b   : > { %p1986_p3 = scmp.lt.s32.totalorder %s1984_s5, %s1980_s17 }
 0xe4c   : > { %p1982_p1 = pnand %p1981_p12, %p2493_p10 }
 0xe4d   : > { %p1987_p4 = por %p1986_p3, %p1985_p5 }
 0xe4e   : > { %p1983_p2 = pneg %p1982_p1 }
 0xe50   : > { %p1988_p8 = pnand %p1987_p4, %p1983_p2 }
 0xe52   : > { %1991 = shalt.err (!%p1988_p8)
}
 0xe53   : > { %1805 = dma.vmem_to_hbm [thread:$0]  (%p2493_p10), %s1482_s29, 128, %s1479_s20, %s1467_s25  }
 0xe54 PF: > { %p1822_p11 = scmp.ge.s32.totalorder %s2050_s14, 2  ;;  %s1493_s16 = sand.u32 1, %s2030_s30  }
 0xe55   : > { %p2494_p13 = scmp.ne.s32.totalorder %s2487_s21, 0  ;;  %s1494_s18 = scalar_lea.sflag [#allocation6], %s1493_s16 }
 0xe57   : > { %p1815_p0 = pnand %p1822_p11, %p2494_p13 }
 0xe59   : > { %p1816_p6 = pneg %p1815_p0 }
 0xe5b   : > { %2025 = dma.done.wait (%p1816_p6), %s1494_s18, 128  }
 0xe5c   : > { %2027 = vsyncadd (%p1816_p6), %s1494_s18, 4294967168  ;;  %s24_s14 = sadd.s32 1, %s2050_s14   ;;  %s2495_s19 = sld [smem:[#allocation13_spill]] }
 0xe5d   : > { %p21_p7 = scmp.ge.s32.totalorder %s24_s14, 4   ;;  %s2496_s30 = smov %s2034_s10 }
 0xe5e   : > { %s2497_s10 = smov %s2038_s11  ;;  %s2498_s11 = smov %s2167_s22 }
 0xe5f   : > { %s2499_s12 = smov %s2046_s13  ;;  %23 = sbr.rel (!%p21_p7) target bundleno = 9 (0x9), region = 107 }
 0xe62   : > { %s2500_s13 = smov %s2495_s19 }
 0xe64   :  { %1499 = vsyncpa [#allocation5], 1 }
 0xe65   :  { %1501 = vsyncpa [#allocation5 + $0x1], 1 }
 0xe66   :  { %1502 = vsyncpa [#allocation8], 1 }
 0xe67   :  { %1503 = vsyncpa [#allocation6], 1 }
 0xe68   :  { %1505 = vsyncpa [#allocation6 + $0x1], 1 }

</bundles_post_ra>
